<compile_context>
chip_gen: v7x
topology: tpu7x:2x2x1
jax: 0.10.0
libtpu: 0.0.40
codegen_flags: <defaults>
</compile_context>

<pallas_src>
import functools

import jax
import jax.numpy as jnp
import numpy as np
from jax import lax
from jax.experimental import pallas as pl
from jax.experimental.pallas import tpu as pltpu


def _lstm_generator_kernel(x_ref, hc_ref, rows_ref,
                           whh0_ref, w1cat_ref,
                           wout_ref, bout_ref,
                           out_ref,
                           ih_scr, hall_scr,
                           *, hidden_dim, seq_len):
    """Whole sequence in one invocation: in-kernel time loop over both layers."""
    H = hidden_dim
    T = seq_len
    B = x_ref.shape[1]

    # ---- Loop-invariant work hoisted out of the recurrence --------------------
    # Layer-0 input contribution + folded bias for all T steps at once
    # (broadcast multiply on the VPU).
    wih0_row = rows_ref[0][None, None, :]            # (1, 1, 4H)  W_ih_l0 column 0
    b0_row = rows_ref[1][None, None, :]              # (1, 1, 4H)  b_ih_l0 + b_hh_l0
    b1 = rows_ref[2][None, :]                        # (1, 4H)     b_ih_l1 + b_hh_l1
    ih_scr[...] = x_ref[...] * wih0_row + b0_row     # (T, B, 4H)

    whh0 = whh0_ref[...]        # (H, 4H)   W_hh_l0^T
    w1 = w1cat_ref[...]         # (2H, 4H)  [W_ih_l1^T ; W_hh_l1^T] stacked on K

    # Gate-select mask (PyTorch gate order i, f, g, o; only g uses tanh).
    # Built once outside the loop: JAX does not CSE broadcast_in_dim.
    lane = lax.broadcasted_iota(jnp.int32, (B, 4 * H), dimension=1)
    g_mask = (lane >= 2 * H) & (lane < 3 * H)

    def lstm_cell(pre, c_prev):
        # Full-vreg sigmoid + tanh ride the EUP slot; lane-mask select on the VPU.
        a = jnp.where(g_mask, jnp.tanh(pre), jax.nn.sigmoid(pre))
        i = a[:, 0 * H:1 * H]
        f = a[:, 1 * H:2 * H]
        g = a[:, 2 * H:3 * H]
        o = a[:, 3 * H:4 * H]
        c_new = f * c_prev + i * g
        h_new = o * jnp.tanh(c_new)
        return h_new, c_new

    def step(t, carry):
        h0, c0, h1, c1 = carry
        # Layer 0: precomputed input term + recurrent matmul.
        pre0 = ih_scr[t] + jnp.dot(h0, whh0, preferred_element_type=jnp.float32)
        h0n, c0n = lstm_cell(pre0, c0)
        # Layer 1: input + recurrent matmuls fused into a single MXU call.
        lhs1 = jnp.concatenate([h0n, h1], axis=1)                    # (B, 2H)
        pre1 = jnp.dot(lhs1, w1, preferred_element_type=jnp.float32) + b1
        h1n, c1n = lstm_cell(pre1, c1)
        hall_scr[t] = h1n                                            # (B, H)
        return (h0n, c0n, h1n, c1n)

    # hc_ref layout: [h|c][layer] -> (h0, c0, h1, c1)
    init = (hc_ref[0, 0], hc_ref[1, 0], hc_ref[0, 1], hc_ref[1, 1])
    lax.fori_loop(0, T, step, init, unroll=True)

    # ---- Output projection hoisted out of the loop -----------------------------
    # One lane-reduce over H and a single dense store of the whole (T, B) slab.
    hall = hall_scr[...]                                             # (T, B, H)
    y = jnp.sum(hall * wout_ref[...], axis=-1) + bout_ref[...]       # (T, B)
    out_ref[...] = y


def _generator_forward_impl(x, hidden, params):
    """Pallas equivalent of Generator.forward(x, hidden) -> (B, T, 1)."""
    h_init, c_init = hidden                     # each (num_layers, B, H)
    B, T = x.shape[0], x.shape[1]
    num_layers, _, H = h_init.shape
    assert num_layers == 2, "kernel implements the module's num_layers=2 LSTM"
    G = 4 * H
    f32 = jnp.float32

    # x.view(B, T, 1) -> time-major (T, B, 1) for the kernel (fused XLA glue).
    x_tm = jnp.transpose(x.reshape(B, T, 1), (1, 0, 2)).astype(f32)

    # Weight / bias preparation (fused under jit, folds if params are constants).
    wih0_row = params['weight_ih_l0'][:, 0].astype(f32)                       # (4H,)
    b0 = (params['bias_ih_l0'] + params['bias_hh_l0']).astype(f32)            # (4H,)
    b1 = (params['bias_ih_l1'] + params['bias_hh_l1']).astype(f32)            # (4H,)
    rows = jnp.stack([wih0_row, b0, b1], axis=0)                              # (3, 4H)
    whh0_t = params['weight_hh_l0'].T.astype(f32)                             # (H, 4H)
    w1cat = jnp.concatenate([params['weight_ih_l1'].T,
                             params['weight_hh_l1'].T], axis=0).astype(f32)   # (2H, 4H)
    wout = params['out_weight'].reshape(1, 1, H).astype(f32)                  # (1,1,H)
    bout = params['out_bias'].reshape(1, 1).astype(f32)                       # (1,1)
    hc = jnp.stack([h_init, c_init], axis=0).astype(f32)                      # (2,2,B,H)

    def full(shape):
        n = len(shape)
        return pl.BlockSpec(shape, lambda i, _n=n: (0,) * _n)

    out_tm = pl.pallas_call(
        functools.partial(_lstm_generator_kernel, hidden_dim=H, seq_len=T),
        out_shape=jax.ShapeDtypeStruct((T, B), jnp.float32),
        grid_spec=pltpu.PrefetchScalarGridSpec(
            num_scalar_prefetch=0,
            grid=(1,),                      # single invocation; loop runs in-kernel
            in_specs=[
                full((T, B, 1)),            # x (time-major)
                full((2, num_layers, B, H)),  # [h_init ; c_init]
                full((3, G)),               # [W_ih_l0 row ; b0_fold ; b1_fold]
                full((H, G)),               # W_hh_l0^T
                full((2 * H, G)),           # [W_ih_l1^T ; W_hh_l1^T]
                full((1, 1, H)),            # out weight
                full((1, 1)),               # out bias
            ],
            out_specs=full((T, B)),
            scratch_shapes=[
                pltpu.VMEM((T, B, G), jnp.float32),   # layer-0 input terms
                pltpu.VMEM((T, B, H), jnp.float32),   # h1 history for fused projection
            ],
        ),
        compiler_params=pltpu.CompilerParams(
            dimension_semantics=("arbitrary",)),
    )(x_tm, hc, rows, whh0_t, w1cat, wout, bout)

    return jnp.transpose(out_tm)[:, :, None]   # back to batch-first (B, T, 1)


generator_forward = jax.jit(_generator_forward_impl)


def reference_forward(x, hidden, params):
    """Pure-JAX reference (PyTorch LSTM semantics) for correctness check."""
    h, c = hidden
    x_tm = jnp.transpose(x, (1, 0, 2))

    def cell(x_t, h_prev, c_prev, wih, whh, bih, bhh):
        gates = x_t @ wih.T + bih + h_prev @ whh.T + bhh
        i, f, g, o = jnp.split(gates, 4, axis=-1)
        c_new = jax.nn.sigmoid(f) * c_prev + jax.nn.sigmoid(i) * jnp.tanh(g)
        h_new = jax.nn.sigmoid(o) * jnp.tanh(c_new)
        return h_new, c_new

    def step(carry, x_t):
        h0, c0, h1, c1 = carry
        h0, c0 = cell(x_t, h0, c0, params['weight_ih_l0'], params['weight_hh_l0'],
                      params['bias_ih_l0'], params['bias_hh_l0'])
        h1, c1 = cell(h0, h1, c1, params['weight_ih_l1'], params['weight_hh_l1'],
                      params['bias_ih_l1'], params['bias_hh_l1'])
        y = h1 @ params['out_weight'].T + params['out_bias']
        return (h0, c0, h1, c1), y

    _, ys = jax.lax.scan(step, (h[0], c[0], h[1], c[1]), x_tm)
    return jnp.transpose(ys, (1, 0, 2))


if __name__ == "__main__":
    # Small shapes consistent with the module's forward.
    seq_length, batch_size, n_features, hidden_dim, num_layers = 8, 2, 1, 32, 2

    key = jax.random.PRNGKey(0)
    keys = jax.random.split(key, 12)
    k = 1.0 / np.sqrt(hidden_dim)

    def u(kk, shape):
        return jax.random.uniform(kk, shape, jnp.float32, minval=-k, maxval=k)

    params = {
        'weight_ih_l0': u(keys[0], (4 * hidden_dim, n_features)),
        'weight_hh_l0': u(keys[1], (4 * hidden_dim, hidden_dim)),
        'bias_ih_l0':   u(keys[2], (4 * hidden_dim,)),
        'bias_hh_l0':   u(keys[3], (4 * hidden_dim,)),
        'weight_ih_l1': u(keys[4], (4 * hidden_dim, hidden_dim)),
        'weight_hh_l1': u(keys[5], (4 * hidden_dim, hidden_dim)),
        'bias_ih_l1':   u(keys[6], (4 * hidden_dim,)),
        'bias_hh_l1':   u(keys[7], (4 * hidden_dim,)),
        'out_weight':   u(keys[8], (1, hidden_dim)),
        'out_bias':     u(keys[9], (1,)),
    }

    x = jax.random.normal(keys[10], (batch_size, seq_length, n_features), jnp.float32)
    # Generator.init_hidden(): zeros of shape (num_layers, batch, hidden)
    hidden = (jnp.zeros((num_layers, batch_size, hidden_dim), jnp.float32),
              jnp.zeros((num_layers, batch_size, hidden_dim), jnp.float32))

    y = generator_forward(x, hidden, params)
    y = jax.block_until_ready(y)

    y_ref = reference_forward(x, hidden, params)
    np.testing.assert_allclose(np.asarray(y), np.asarray(y_ref), rtol=1e-4, atol=1e-5)
    assert y.shape == (batch_size, seq_length, 1)

    print("KERNEL_OK")
</pallas_src>

<mosaic_0001>
module attributes {stable_mosaic.version = 11 : i64} {
  func.func @_lstm_generator_kernel(%arg0: i32, %arg1: memref<8x2x1xf32, #tpu.memory_space<vmem>>, %arg2: memref<2x2x2x32xf32, #tpu.memory_space<vmem>>, %arg3: memref<3x128xf32, #tpu.memory_space<vmem>>, %arg4: memref<32x128xf32, #tpu.memory_space<vmem>>, %arg5: memref<64x128xf32, #tpu.memory_space<vmem>>, %arg6: memref<1x1x32xf32, #tpu.memory_space<vmem>>, %arg7: memref<1x1xf32, #tpu.memory_space<vmem>>, %arg8: memref<8x2xf32, #tpu.memory_space<vmem>>, %arg9: memref<8x2x128xf32, #tpu.memory_space<vmem>>, %arg10: memref<8x2x32xf32, #tpu.memory_space<vmem>>) attributes {dimension_semantics = [#tpu.dimension_semantics<arbitrary>], iteration_bounds = array<i64: 1>, scalar_prefetch = 0 : i64, scratch_operands = 2 : i64, tpu.core_type = #tpu.core_type<tc>, window_params = [{pipeline_mode = #tpu.pipeline_mode<synchronous>, transform_indices = @transform_0, window_bounds = array<i64: 8, 2, 1>}, {pipeline_mode = #tpu.pipeline_mode<synchronous>, transform_indices = @transform_1, window_bounds = array<i64: 2, 2, 2, 32>}, {pipeline_mode = #tpu.pipeline_mode<synchronous>, transform_indices = @transform_2, window_bounds = array<i64: 3, 128>}, {pipeline_mode = #tpu.pipeline_mode<synchronous>, transform_indices = @transform_3, window_bounds = array<i64: 32, 128>}, {pipeline_mode = #tpu.pipeline_mode<synchronous>, transform_indices = @transform_4, window_bounds = array<i64: 64, 128>}, {pipeline_mode = #tpu.pipeline_mode<synchronous>, transform_indices = @transform_5, window_bounds = array<i64: 1, 1, 32>}, {pipeline_mode = #tpu.pipeline_mode<synchronous>, transform_indices = @transform_6, window_bounds = array<i64: 1, 1>}, {pipeline_mode = #tpu.pipeline_mode<synchronous>, transform_indices = @transform_7, window_bounds = array<i64: 8, 2>}]} {
    %c0 = arith.constant 0 : index
    %c0_0 = arith.constant 0 : index
    %0 = vector.load %arg3[%c0, %c0_0] : memref<3x128xf32, #tpu.memory_space<vmem>>, vector<1x128xf32>
    %1 = vector.shape_cast %0 : vector<1x128xf32> to vector<128xf32>
    %2 = vector.shape_cast %1 : vector<128xf32> to vector<1x1x128xf32>
    %c1 = arith.constant 1 : index
    %c0_1 = arith.constant 0 : index
    %3 = vector.load %arg3[%c1, %c0_1] : memref<3x128xf32, #tpu.memory_space<vmem>>, vector<1x128xf32>
    %4 = vector.shape_cast %3 : vector<1x128xf32> to vector<128xf32>
    %5 = vector.shape_cast %4 : vector<128xf32> to vector<1x1x128xf32>
    %c2 = arith.constant 2 : index
    %c0_2 = arith.constant 0 : index
    %6 = vector.load %arg3[%c2, %c0_2] : memref<3x128xf32, #tpu.memory_space<vmem>>, vector<1x128xf32>
    %7 = vector.shape_cast %6 : vector<1x128xf32> to vector<128xf32>
    %8 = vector.shape_cast %7 : vector<128xf32> to vector<1x128xf32>
    %c0_3 = arith.constant 0 : index
    %c0_4 = arith.constant 0 : index
    %c0_5 = arith.constant 0 : index
    %9 = vector.load %arg1[%c0_3, %c0_4, %c0_5] : memref<8x2x1xf32, #tpu.memory_space<vmem>>, vector<8x2x1xf32>
    %10 = vector.broadcast %9 : vector<8x2x1xf32> to vector<8x2x128xf32>
    %11 = vector.broadcast %2 : vector<1x1x128xf32> to vector<8x2x128xf32>
    %12 = arith.mulf %10, %11 : vector<8x2x128xf32>
    %13 = vector.broadcast %5 : vector<1x1x128xf32> to vector<8x2x128xf32>
    %14 = arith.addf %12, %13 : vector<8x2x128xf32>
    %c0_6 = arith.constant 0 : index
    %c0_7 = arith.constant 0 : index
    %c0_8 = arith.constant 0 : index
    %15 = vector.load %arg9[%c0_6, %c0_7, %c0_8] : memref<8x2x128xf32, #tpu.memory_space<vmem>>, vector<8x2x128xf32>
    tpu.vector_store %arg9[%c0_6, %c0_7, %c0_8], %14 {strides = array<i32>} : memref<8x2x128xf32, #tpu.memory_space<vmem>>, vector<8x2x128xf32>,
    %c0_9 = arith.constant 0 : index
    %c0_10 = arith.constant 0 : index
    %16 = vector.load %arg4[%c0_9, %c0_10] : memref<32x128xf32, #tpu.memory_space<vmem>>, vector<32x128xf32>
    %c0_11 = arith.constant 0 : index
    %c0_12 = arith.constant 0 : index
    %17 = vector.load %arg5[%c0_11, %c0_12] : memref<64x128xf32, #tpu.memory_space<vmem>>, vector<64x128xf32>
    %18 = tpu.iota {dimensions = array<i32: 1>} : vector<2x128xi32>
    %c64_i32 = arith.constant 64 : i32
    %19 = vector.broadcast %c64_i32 : i32 to vector<2x128xi32>
    %20 = arith.cmpi sge, %18, %19 : vector<2x128xi32>
    %c96_i32 = arith.constant 96 : i32
    %21 = vector.broadcast %c96_i32 : i32 to vector<2x128xi32>
    %22 = arith.cmpi slt, %18, %21 : vector<2x128xi32>
    %23 = arith.andi %20, %22 : vector<2x128xi1>
    %c0_13 = arith.constant 0 : index
    %c0_14 = arith.constant 0 : index
    %c0_15 = arith.constant 0 : index
    %c0_16 = arith.constant 0 : index
    %24 = vector.load %arg2[%c0_13, %c0_14, %c0_15, %c0_16] : memref<2x2x2x32xf32, #tpu.memory_space<vmem>>, vector<1x1x2x32xf32>
    %25 = vector.shape_cast %24 : vector<1x1x2x32xf32> to vector<2x32xf32>
    %c1_17 = arith.constant 1 : index
    %c0_18 = arith.constant 0 : index
    %c0_19 = arith.constant 0 : index
    %c0_20 = arith.constant 0 : index
    %26 = vector.load %arg2[%c1_17, %c0_18, %c0_19, %c0_20] : memref<2x2x2x32xf32, #tpu.memory_space<vmem>>, vector<1x1x2x32xf32>
    %27 = vector.shape_cast %26 : vector<1x1x2x32xf32> to vector<2x32xf32>
    %c0_21 = arith.constant 0 : index
    %c1_22 = arith.constant 1 : index
    %c0_23 = arith.constant 0 : index
    %c0_24 = arith.constant 0 : index
    %28 = vector.load %arg2[%c0_21, %c1_22, %c0_23, %c0_24] : memref<2x2x2x32xf32, #tpu.memory_space<vmem>>, vector<1x1x2x32xf32>
    %29 = vector.shape_cast %28 : vector<1x1x2x32xf32> to vector<2x32xf32>
    %c1_25 = arith.constant 1 : index
    %c1_26 = arith.constant 1 : index
    %c0_27 = arith.constant 0 : index
    %c0_28 = arith.constant 0 : index
    %30 = vector.load %arg2[%c1_25, %c1_26, %c0_27, %c0_28] : memref<2x2x2x32xf32, #tpu.memory_space<vmem>>, vector<1x1x2x32xf32>
    %31 = vector.shape_cast %30 : vector<1x1x2x32xf32> to vector<2x32xf32>
    %c0_i32 = arith.constant 0 : i32
    %32 = arith.index_cast %c0_i32 : i32 to index
    %c0_29 = arith.constant 0 : index
    %c0_30 = arith.constant 0 : index
    %33 = vector.load %arg9[%32, %c0_29, %c0_30] : memref<8x2x128xf32, #tpu.memory_space<vmem>>, vector<1x2x128xf32>
    %34 = vector.shape_cast %33 : vector<1x2x128xf32> to vector<2x128xf32>
    %cst = arith.constant dense<0.000000e+00> : vector<2x128xf32>
    %35 = tpu.matmul %25, %16, %cst {dimension_numbers = #tpu.dot_dimension_numbers<[1], [0], [0], [1], [0, 0, 1, 1], [], []>} : vector<2x32xf32>, vector<32x128xf32>, vector<2x128xf32> -> vector<2x128xf32>
    %36 = arith.addf %34, %35 : vector<2x128xf32>
    %37 = math.tanh %36 : vector<2x128xf32>
    %38 = arith.negf %36 : vector<2x128xf32>
    %39 = math.exp %38 : vector<2x128xf32>
    %cst_31 = arith.constant 1.000000e+00 : f32
    %40 = vector.broadcast %cst_31 : f32 to vector<2x128xf32>
    %41 = arith.addf %40, %39 : vector<2x128xf32>
    %42 = arith.divf %40, %41 : vector<2x128xf32>
    %43 = arith.select %23, %37, %42 : vector<2x128xi1>, vector<2x128xf32>
    %44 = vector.extract_strided_slice %43 {offsets = [0, 0], sizes = [2, 32], strides = [1, 1]} : vector<2x128xf32> to vector<2x32xf32>
    %45 = vector.extract_strided_slice %43 {offsets = [0, 32], sizes = [2, 32], strides = [1, 1]} : vector<2x128xf32> to vector<2x32xf32>
    %46 = vector.extract_strided_slice %43 {offsets = [0, 64], sizes = [2, 32], strides = [1, 1]} : vector<2x128xf32> to vector<2x32xf32>
    %47 = vector.extract_strided_slice %43 {offsets = [0, 96], sizes = [2, 32], strides = [1, 1]} : vector<2x128xf32> to vector<2x32xf32>
    %48 = arith.mulf %45, %27 : vector<2x32xf32>
    %49 = arith.mulf %44, %46 : vector<2x32xf32>
    %50 = arith.addf %48, %49 : vector<2x32xf32>
    %51 = math.tanh %50 : vector<2x32xf32>
    %52 = arith.mulf %47, %51 : vector<2x32xf32>
    %53 = tpu.concatenate %52, %29 in 1 : vector<2x32xf32>, vector<2x32xf32> -> vector<2x64xf32>
    %cst_32 = arith.constant dense<0.000000e+00> : vector<2x128xf32>
    %54 = tpu.matmul %53, %17, %cst_32 {dimension_numbers = #tpu.dot_dimension_numbers<[1], [0], [0], [1], [0, 0, 1, 1], [], []>} : vector<2x64xf32>, vector<64x128xf32>, vector<2x128xf32> -> vector<2x128xf32>
    %55 = vector.broadcast %8 : vector<1x128xf32> to vector<2x128xf32>
    %56 = arith.addf %54, %55 : vector<2x128xf32>
    %57 = math.tanh %56 : vector<2x128xf32>
    %58 = arith.negf %56 : vector<2x128xf32>
    %59 = math.exp %58 : vector<2x128xf32>
    %cst_33 = arith.constant 1.000000e+00 : f32
    %60 = vector.broadcast %cst_33 : f32 to vector<2x128xf32>
    %61 = arith.addf %60, %59 : vector<2x128xf32>
    %62 = arith.divf %60, %61 : vector<2x128xf32>
    %63 = arith.select %23, %57, %62 : vector<2x128xi1>, vector<2x128xf32>
    %64 = vector.extract_strided_slice %63 {offsets = [0, 0], sizes = [2, 32], strides = [1, 1]} : vector<2x128xf32> to vector<2x32xf32>
    %65 = vector.extract_strided_slice %63 {offsets = [0, 32], sizes = [2, 32], strides = [1, 1]} : vector<2x128xf32> to vector<2x32xf32>
    %66 = vector.extract_strided_slice %63 {offsets = [0, 64], sizes = [2, 32], strides = [1, 1]} : vector<2x128xf32> to vector<2x32xf32>
    %67 = vector.extract_strided_slice %63 {offsets = [0, 96], sizes = [2, 32], strides = [1, 1]} : vector<2x128xf32> to vector<2x32xf32>
    %68 = arith.mulf %65, %31 : vector<2x32xf32>
    %69 = arith.mulf %64, %66 : vector<2x32xf32>
    %70 = arith.addf %68, %69 : vector<2x32xf32>
    %71 = math.tanh %70 : vector<2x32xf32>
    %72 = arith.mulf %67, %71 : vector<2x32xf32>
    %73 = arith.index_cast %c0_i32 : i32 to index
    %c0_34 = arith.constant 0 : index
    %c0_35 = arith.constant 0 : index
    %74 = vector.load %arg10[%73, %c0_34, %c0_35] : memref<8x2x32xf32, #tpu.memory_space<vmem>>, vector<1x2x32xf32>
    %75 = vector.shape_cast %74 : vector<1x2x32xf32> to vector<2x32xf32>
    %76 = vector.shape_cast %72 : vector<2x32xf32> to vector<1x2x32xf32>
    tpu.vector_store %arg10[%73, %c0_34, %c0_35], %76 {strides = array<i32>} : memref<8x2x32xf32, #tpu.memory_space<vmem>>, vector<1x2x32xf32>,
    %c1_i32 = arith.constant 1 : i32
    %77 = arith.index_cast %c1_i32 : i32 to index
    %c0_36 = arith.constant 0 : index
    %c0_37 = arith.constant 0 : index
    %78 = vector.load %arg9[%77, %c0_36, %c0_37] : memref<8x2x128xf32, #tpu.memory_space<vmem>>, vector<1x2x128xf32>
    %79 = vector.shape_cast %78 : vector<1x2x128xf32> to vector<2x128xf32>
    %cst_38 = arith.constant dense<0.000000e+00> : vector<2x128xf32>
    %80 = tpu.matmul %52, %16, %cst_38 {dimension_numbers = #tpu.dot_dimension_numbers<[1], [0], [0], [1], [0, 0, 1, 1], [], []>} : vector<2x32xf32>, vector<32x128xf32>, vector<2x128xf32> -> vector<2x128xf32>
    %81 = arith.addf %79, %80 : vector<2x128xf32>
    %82 = math.tanh %81 : vector<2x128xf32>
    %83 = arith.negf %81 : vector<2x128xf32>
    %84 = math.exp %83 : vector<2x128xf32>
    %cst_39 = arith.constant 1.000000e+00 : f32
    %85 = vector.broadcast %cst_39 : f32 to vector<2x128xf32>
    %86 = arith.addf %85, %84 : vector<2x128xf32>
    %87 = arith.divf %85, %86 : vector<2x128xf32>
    %88 = arith.select %23, %82, %87 : vector<2x128xi1>, vector<2x128xf32>
    %89 = vector.extract_strided_slice %88 {offsets = [0, 0], sizes = [2, 32], strides = [1, 1]} : vector<2x128xf32> to vector<2x32xf32>
    %90 = vector.extract_strided_slice %88 {offsets = [0, 32], sizes = [2, 32], strides = [1, 1]} : vector<2x128xf32> to vector<2x32xf32>
    %91 = vector.extract_strided_slice %88 {offsets = [0, 64], sizes = [2, 32], strides = [1, 1]} : vector<2x128xf32> to vector<2x32xf32>
    %92 = vector.extract_strided_slice %88 {offsets = [0, 96], sizes = [2, 32], strides = [1, 1]} : vector<2x128xf32> to vector<2x32xf32>
    %93 = arith.mulf %90, %50 : vector<2x32xf32>
    %94 = arith.mulf %89, %91 : vector<2x32xf32>
    %95 = arith.addf %93, %94 : vector<2x32xf32>
    %96 = math.tanh %95 : vector<2x32xf32>
    %97 = arith.mulf %92, %96 : vector<2x32xf32>
    %98 = tpu.concatenate %97, %72 in 1 : vector<2x32xf32>, vector<2x32xf32> -> vector<2x64xf32>
    %cst_40 = arith.constant dense<0.000000e+00> : vector<2x128xf32>
    %99 = tpu.matmul %98, %17, %cst_40 {dimension_numbers = #tpu.dot_dimension_numbers<[1], [0], [0], [1], [0, 0, 1, 1], [], []>} : vector<2x64xf32>, vector<64x128xf32>, vector<2x128xf32> -> vector<2x128xf32>
    %100 = vector.broadcast %8 : vector<1x128xf32> to vector<2x128xf32>
    %101 = arith.addf %99, %100 : vector<2x128xf32>
    %102 = math.tanh %101 : vector<2x128xf32>
    %103 = arith.negf %101 : vector<2x128xf32>
    %104 = math.exp %103 : vector<2x128xf32>
    %cst_41 = arith.constant 1.000000e+00 : f32
    %105 = vector.broadcast %cst_41 : f32 to vector<2x128xf32>
    %106 = arith.addf %105, %104 : vector<2x128xf32>
    %107 = arith.divf %105, %106 : vector<2x128xf32>
    %108 = arith.select %23, %102, %107 : vector<2x128xi1>, vector<2x128xf32>
    %109 = vector.extract_strided_slice %108 {offsets = [0, 0], sizes = [2, 32], strides = [1, 1]} : vector<2x128xf32> to vector<2x32xf32>
    %110 = vector.extract_strided_slice %108 {offsets = [0, 32], sizes = [2, 32], strides = [1, 1]} : vector<2x128xf32> to vector<2x32xf32>
    %111 = vector.extract_strided_slice %108 {offsets = [0, 64], sizes = [2, 32], strides = [1, 1]} : vector<2x128xf32> to vector<2x32xf32>
    %112 = vector.extract_strided_slice %108 {offsets = [0, 96], sizes = [2, 32], strides = [1, 1]} : vector<2x128xf32> to vector<2x32xf32>
    %113 = arith.mulf %110, %70 : vector<2x32xf32>
    %114 = arith.mulf %109, %111 : vector<2x32xf32>
    %115 = arith.addf %113, %114 : vector<2x32xf32>
    %116 = math.tanh %115 : vector<2x32xf32>
    %117 = arith.mulf %112, %116 : vector<2x32xf32>
    %118 = arith.index_cast %c1_i32 : i32 to index
    %c0_42 = arith.constant 0 : index
    %c0_43 = arith.constant 0 : index
    %119 = vector.load %arg10[%118, %c0_42, %c0_43] : memref<8x2x32xf32, #tpu.memory_space<vmem>>, vector<1x2x32xf32>
    %120 = vector.shape_cast %119 : vector<1x2x32xf32> to vector<2x32xf32>
    %121 = vector.shape_cast %117 : vector<2x32xf32> to vector<1x2x32xf32>
    tpu.vector_store %arg10[%118, %c0_42, %c0_43], %121 {strides = array<i32>} : memref<8x2x32xf32, #tpu.memory_space<vmem>>, vector<1x2x32xf32>,
    %c2_i32 = arith.constant 2 : i32
    %122 = arith.index_cast %c2_i32 : i32 to index
    %c0_44 = arith.constant 0 : index
    %c0_45 = arith.constant 0 : index
    %123 = vector.load %arg9[%122, %c0_44, %c0_45] : memref<8x2x128xf32, #tpu.memory_space<vmem>>, vector<1x2x128xf32>
    %124 = vector.shape_cast %123 : vector<1x2x128xf32> to vector<2x128xf32>
    %cst_46 = arith.constant dense<0.000000e+00> : vector<2x128xf32>
    %125 = tpu.matmul %97, %16, %cst_46 {dimension_numbers = #tpu.dot_dimension_numbers<[1], [0], [0], [1], [0, 0, 1, 1], [], []>} : vector<2x32xf32>, vector<32x128xf32>, vector<2x128xf32> -> vector<2x128xf32>
    %126 = arith.addf %124, %125 : vector<2x128xf32>
    %127 = math.tanh %126 : vector<2x128xf32>
    %128 = arith.negf %126 : vector<2x128xf32>
    %129 = math.exp %128 : vector<2x128xf32>
    %cst_47 = arith.constant 1.000000e+00 : f32
    %130 = vector.broadcast %cst_47 : f32 to vector<2x128xf32>
    %131 = arith.addf %130, %129 : vector<2x128xf32>
    %132 = arith.divf %130, %131 : vector<2x128xf32>
    %133 = arith.select %23, %127, %132 : vector<2x128xi1>, vector<2x128xf32>
    %134 = vector.extract_strided_slice %133 {offsets = [0, 0], sizes = [2, 32], strides = [1, 1]} : vector<2x128xf32> to vector<2x32xf32>
    %135 = vector.extract_strided_slice %133 {offsets = [0, 32], sizes = [2, 32], strides = [1, 1]} : vector<2x128xf32> to vector<2x32xf32>
    %136 = vector.extract_strided_slice %133 {offsets = [0, 64], sizes = [2, 32], strides = [1, 1]} : vector<2x128xf32> to vector<2x32xf32>
    %137 = vector.extract_strided_slice %133 {offsets = [0, 96], sizes = [2, 32], strides = [1, 1]} : vector<2x128xf32> to vector<2x32xf32>
    %138 = arith.mulf %135, %95 : vector<2x32xf32>
    %139 = arith.mulf %134, %136 : vector<2x32xf32>
    %140 = arith.addf %138, %139 : vector<2x32xf32>
    %141 = math.tanh %140 : vector<2x32xf32>
    %142 = arith.mulf %137, %141 : vector<2x32xf32>
    %143 = tpu.concatenate %142, %117 in 1 : vector<2x32xf32>, vector<2x32xf32> -> vector<2x64xf32>
    %cst_48 = arith.constant dense<0.000000e+00> : vector<2x128xf32>
    %144 = tpu.matmul %143, %17, %cst_48 {dimension_numbers = #tpu.dot_dimension_numbers<[1], [0], [0], [1], [0, 0, 1, 1], [], []>} : vector<2x64xf32>, vector<64x128xf32>, vector<2x128xf32> -> vector<2x128xf32>
    %145 = vector.broadcast %8 : vector<1x128xf32> to vector<2x128xf32>
    %146 = arith.addf %144, %145 : vector<2x128xf32>
    %147 = math.tanh %146 : vector<2x128xf32>
    %148 = arith.negf %146 : vector<2x128xf32>
    %149 = math.exp %148 : vector<2x128xf32>
    %cst_49 = arith.constant 1.000000e+00 : f32
    %150 = vector.broadcast %cst_49 : f32 to vector<2x128xf32>
    %151 = arith.addf %150, %149 : vector<2x128xf32>
    %152 = arith.divf %150, %151 : vector<2x128xf32>
    %153 = arith.select %23, %147, %152 : vector<2x128xi1>, vector<2x128xf32>
    %154 = vector.extract_strided_slice %153 {offsets = [0, 0], sizes = [2, 32], strides = [1, 1]} : vector<2x128xf32> to vector<2x32xf32>
    %155 = vector.extract_strided_slice %153 {offsets = [0, 32], sizes = [2, 32], strides = [1, 1]} : vector<2x128xf32> to vector<2x32xf32>
    %156 = vector.extract_strided_slice %153 {offsets = [0, 64], sizes = [2, 32], strides = [1, 1]} : vector<2x128xf32> to vector<2x32xf32>
    %157 = vector.extract_strided_slice %153 {offsets = [0, 96], sizes = [2, 32], strides = [1, 1]} : vector<2x128xf32> to vector<2x32xf32>
    %158 = arith.mulf %155, %115 : vector<2x32xf32>
    %159 = arith.mulf %154, %156 : vector<2x32xf32>
    %160 = arith.addf %158, %159 : vector<2x32xf32>
    %161 = math.tanh %160 : vector<2x32xf32>
    %162 = arith.mulf %157, %161 : vector<2x32xf32>
    %163 = arith.index_cast %c2_i32 : i32 to index
    %c0_50 = arith.constant 0 : index
    %c0_51 = arith.constant 0 : index
    %164 = vector.load %arg10[%163, %c0_50, %c0_51] : memref<8x2x32xf32, #tpu.memory_space<vmem>>, vector<1x2x32xf32>
    %165 = vector.shape_cast %164 : vector<1x2x32xf32> to vector<2x32xf32>
    %166 = vector.shape_cast %162 : vector<2x32xf32> to vector<1x2x32xf32>
    tpu.vector_store %arg10[%163, %c0_50, %c0_51], %166 {strides = array<i32>} : memref<8x2x32xf32, #tpu.memory_space<vmem>>, vector<1x2x32xf32>,
    %c3_i32 = arith.constant 3 : i32
    %167 = arith.index_cast %c3_i32 : i32 to index
    %c0_52 = arith.constant 0 : index
    %c0_53 = arith.constant 0 : index
    %168 = vector.load %arg9[%167, %c0_52, %c0_53] : memref<8x2x128xf32, #tpu.memory_space<vmem>>, vector<1x2x128xf32>
    %169 = vector.shape_cast %168 : vector<1x2x128xf32> to vector<2x128xf32>
    %cst_54 = arith.constant dense<0.000000e+00> : vector<2x128xf32>
    %170 = tpu.matmul %142, %16, %cst_54 {dimension_numbers = #tpu.dot_dimension_numbers<[1], [0], [0], [1], [0, 0, 1, 1], [], []>} : vector<2x32xf32>, vector<32x128xf32>, vector<2x128xf32> -> vector<2x128xf32>
    %171 = arith.addf %169, %170 : vector<2x128xf32>
    %172 = math.tanh %171 : vector<2x128xf32>
    %173 = arith.negf %171 : vector<2x128xf32>
    %174 = math.exp %173 : vector<2x128xf32>
    %cst_55 = arith.constant 1.000000e+00 : f32
    %175 = vector.broadcast %cst_55 : f32 to vector<2x128xf32>
    %176 = arith.addf %175, %174 : vector<2x128xf32>
    %177 = arith.divf %175, %176 : vector<2x128xf32>
    %178 = arith.select %23, %172, %177 : vector<2x128xi1>, vector<2x128xf32>
    %179 = vector.extract_strided_slice %178 {offsets = [0, 0], sizes = [2, 32], strides = [1, 1]} : vector<2x128xf32> to vector<2x32xf32>
    %180 = vector.extract_strided_slice %178 {offsets = [0, 32], sizes = [2, 32], strides = [1, 1]} : vector<2x128xf32> to vector<2x32xf32>
    %181 = vector.extract_strided_slice %178 {offsets = [0, 64], sizes = [2, 32], strides = [1, 1]} : vector<2x128xf32> to vector<2x32xf32>
    %182 = vector.extract_strided_slice %178 {offsets = [0, 96], sizes = [2, 32], strides = [1, 1]} : vector<2x128xf32> to vector<2x32xf32>
    %183 = arith.mulf %180, %140 : vector<2x32xf32>
    %184 = arith.mulf %179, %181 : vector<2x32xf32>
    %185 = arith.addf %183, %184 : vector<2x32xf32>
    %186 = math.tanh %185 : vector<2x32xf32>
    %187 = arith.mulf %182, %186 : vector<2x32xf32>
    %188 = tpu.concatenate %187, %162 in 1 : vector<2x32xf32>, vector<2x32xf32> -> vector<2x64xf32>
    %cst_56 = arith.constant dense<0.000000e+00> : vector<2x128xf32>
    %189 = tpu.matmul %188, %17, %cst_56 {dimension_numbers = #tpu.dot_dimension_numbers<[1], [0], [0], [1], [0, 0, 1, 1], [], []>} : vector<2x64xf32>, vector<64x128xf32>, vector<2x128xf32> -> vector<2x128xf32>
    %190 = vector.broadcast %8 : vector<1x128xf32> to vector<2x128xf32>
    %191 = arith.addf %189, %190 : vector<2x128xf32>
    %192 = math.tanh %191 : vector<2x128xf32>
    %193 = arith.negf %191 : vector<2x128xf32>
    %194 = math.exp %193 : vector<2x128xf32>
    %cst_57 = arith.constant 1.000000e+00 : f32
    %195 = vector.broadcast %cst_57 : f32 to vector<2x128xf32>
    %196 = arith.addf %195, %194 : vector<2x128xf32>
    %197 = arith.divf %195, %196 : vector<2x128xf32>
    %198 = arith.select %23, %192, %197 : vector<2x128xi1>, vector<2x128xf32>
    %199 = vector.extract_strided_slice %198 {offsets = [0, 0], sizes = [2, 32], strides = [1, 1]} : vector<2x128xf32> to vector<2x32xf32>
    %200 = vector.extract_strided_slice %198 {offsets = [0, 32], sizes = [2, 32], strides = [1, 1]} : vector<2x128xf32> to vector<2x32xf32>
    %201 = vector.extract_strided_slice %198 {offsets = [0, 64], sizes = [2, 32], strides = [1, 1]} : vector<2x128xf32> to vector<2x32xf32>
    %202 = vector.extract_strided_slice %198 {offsets = [0, 96], sizes = [2, 32], strides = [1, 1]} : vector<2x128xf32> to vector<2x32xf32>
    %203 = arith.mulf %200, %160 : vector<2x32xf32>
    %204 = arith.mulf %199, %201 : vector<2x32xf32>
    %205 = arith.addf %203, %204 : vector<2x32xf32>
    %206 = math.tanh %205 : vector<2x32xf32>
    %207 = arith.mulf %202, %206 : vector<2x32xf32>
    %208 = arith.index_cast %c3_i32 : i32 to index
    %c0_58 = arith.constant 0 : index
    %c0_59 = arith.constant 0 : index
    %209 = vector.load %arg10[%208, %c0_58, %c0_59] : memref<8x2x32xf32, #tpu.memory_space<vmem>>, vector<1x2x32xf32>
    %210 = vector.shape_cast %209 : vector<1x2x32xf32> to vector<2x32xf32>
    %211 = vector.shape_cast %207 : vector<2x32xf32> to vector<1x2x32xf32>
    tpu.vector_store %arg10[%208, %c0_58, %c0_59], %211 {strides = array<i32>} : memref<8x2x32xf32, #tpu.memory_space<vmem>>, vector<1x2x32xf32>,
    %c4_i32 = arith.constant 4 : i32
    %212 = arith.index_cast %c4_i32 : i32 to index
    %c0_60 = arith.constant 0 : index
    %c0_61 = arith.constant 0 : index
    %213 = vector.load %arg9[%212, %c0_60, %c0_61] : memref<8x2x128xf32, #tpu.memory_space<vmem>>, vector<1x2x128xf32>
    %214 = vector.shape_cast %213 : vector<1x2x128xf32> to vector<2x128xf32>
    %cst_62 = arith.constant dense<0.000000e+00> : vector<2x128xf32>
    %215 = tpu.matmul %187, %16, %cst_62 {dimension_numbers = #tpu.dot_dimension_numbers<[1], [0], [0], [1], [0, 0, 1, 1], [], []>} : vector<2x32xf32>, vector<32x128xf32>, vector<2x128xf32> -> vector<2x128xf32>
    %216 = arith.addf %214, %215 : vector<2x128xf32>
    %217 = math.tanh %216 : vector<2x128xf32>
    %218 = arith.negf %216 : vector<2x128xf32>
    %219 = math.exp %218 : vector<2x128xf32>
    %cst_63 = arith.constant 1.000000e+00 : f32
    %220 = vector.broadcast %cst_63 : f32 to vector<2x128xf32>
    %221 = arith.addf %220, %219 : vector<2x128xf32>
    %222 = arith.divf %220, %221 : vector<2x128xf32>
    %223 = arith.select %23, %217, %222 : vector<2x128xi1>, vector<2x128xf32>
    %224 = vector.extract_strided_slice %223 {offsets = [0, 0], sizes = [2, 32], strides = [1, 1]} : vector<2x128xf32> to vector<2x32xf32>
    %225 = vector.extract_strided_slice %223 {offsets = [0, 32], sizes = [2, 32], strides = [1, 1]} : vector<2x128xf32> to vector<2x32xf32>
    %226 = vector.extract_strided_slice %223 {offsets = [0, 64], sizes = [2, 32], strides = [1, 1]} : vector<2x128xf32> to vector<2x32xf32>
    %227 = vector.extract_strided_slice %223 {offsets = [0, 96], sizes = [2, 32], strides = [1, 1]} : vector<2x128xf32> to vector<2x32xf32>
    %228 = arith.mulf %225, %185 : vector<2x32xf32>
    %229 = arith.mulf %224, %226 : vector<2x32xf32>
    %230 = arith.addf %228, %229 : vector<2x32xf32>
    %231 = math.tanh %230 : vector<2x32xf32>
    %232 = arith.mulf %227, %231 : vector<2x32xf32>
    %233 = tpu.concatenate %232, %207 in 1 : vector<2x32xf32>, vector<2x32xf32> -> vector<2x64xf32>
    %cst_64 = arith.constant dense<0.000000e+00> : vector<2x128xf32>
    %234 = tpu.matmul %233, %17, %cst_64 {dimension_numbers = #tpu.dot_dimension_numbers<[1], [0], [0], [1], [0, 0, 1, 1], [], []>} : vector<2x64xf32>, vector<64x128xf32>, vector<2x128xf32> -> vector<2x128xf32>
    %235 = vector.broadcast %8 : vector<1x128xf32> to vector<2x128xf32>
    %236 = arith.addf %234, %235 : vector<2x128xf32>
    %237 = math.tanh %236 : vector<2x128xf32>
    %238 = arith.negf %236 : vector<2x128xf32>
    %239 = math.exp %238 : vector<2x128xf32>
    %cst_65 = arith.constant 1.000000e+00 : f32
    %240 = vector.broadcast %cst_65 : f32 to vector<2x128xf32>
    %241 = arith.addf %240, %239 : vector<2x128xf32>
    %242 = arith.divf %240, %241 : vector<2x128xf32>
    %243 = arith.select %23, %237, %242 : vector<2x128xi1>, vector<2x128xf32>
    %244 = vector.extract_strided_slice %243 {offsets = [0, 0], sizes = [2, 32], strides = [1, 1]} : vector<2x128xf32> to vector<2x32xf32>
    %245 = vector.extract_strided_slice %243 {offsets = [0, 32], sizes = [2, 32], strides = [1, 1]} : vector<2x128xf32> to vector<2x32xf32>
    %246 = vector.extract_strided_slice %243 {offsets = [0, 64], sizes = [2, 32], strides = [1, 1]} : vector<2x128xf32> to vector<2x32xf32>
    %247 = vector.extract_strided_slice %243 {offsets = [0, 96], sizes = [2, 32], strides = [1, 1]} : vector<2x128xf32> to vector<2x32xf32>
    %248 = arith.mulf %245, %205 : vector<2x32xf32>
    %249 = arith.mulf %244, %246 : vector<2x32xf32>
    %250 = arith.addf %248, %249 : vector<2x32xf32>
    %251 = math.tanh %250 : vector<2x32xf32>
    %252 = arith.mulf %247, %251 : vector<2x32xf32>
    %253 = arith.index_cast %c4_i32 : i32 to index
    %c0_66 = arith.constant 0 : index
    %c0_67 = arith.constant 0 : index
    %254 = vector.load %arg10[%253, %c0_66, %c0_67] : memref<8x2x32xf32, #tpu.memory_space<vmem>>, vector<1x2x32xf32>
    %255 = vector.shape_cast %254 : vector<1x2x32xf32> to vector<2x32xf32>
    %256 = vector.shape_cast %252 : vector<2x32xf32> to vector<1x2x32xf32>
    tpu.vector_store %arg10[%253, %c0_66, %c0_67], %256 {strides = array<i32>} : memref<8x2x32xf32, #tpu.memory_space<vmem>>, vector<1x2x32xf32>,
    %c5_i32 = arith.constant 5 : i32
    %257 = arith.index_cast %c5_i32 : i32 to index
    %c0_68 = arith.constant 0 : index
    %c0_69 = arith.constant 0 : index
    %258 = vector.load %arg9[%257, %c0_68, %c0_69] : memref<8x2x128xf32, #tpu.memory_space<vmem>>, vector<1x2x128xf32>
    %259 = vector.shape_cast %258 : vector<1x2x128xf32> to vector<2x128xf32>
    %cst_70 = arith.constant dense<0.000000e+00> : vector<2x128xf32>
    %260 = tpu.matmul %232, %16, %cst_70 {dimension_numbers = #tpu.dot_dimension_numbers<[1], [0], [0], [1], [0, 0, 1, 1], [], []>} : vector<2x32xf32>, vector<32x128xf32>, vector<2x128xf32> -> vector<2x128xf32>
    %261 = arith.addf %259, %260 : vector<2x128xf32>
    %262 = math.tanh %261 : vector<2x128xf32>
    %263 = arith.negf %261 : vector<2x128xf32>
    %264 = math.exp %263 : vector<2x128xf32>
    %cst_71 = arith.constant 1.000000e+00 : f32
    %265 = vector.broadcast %cst_71 : f32 to vector<2x128xf32>
    %266 = arith.addf %265, %264 : vector<2x128xf32>
    %267 = arith.divf %265, %266 : vector<2x128xf32>
    %268 = arith.select %23, %262, %267 : vector<2x128xi1>, vector<2x128xf32>
    %269 = vector.extract_strided_slice %268 {offsets = [0, 0], sizes = [2, 32], strides = [1, 1]} : vector<2x128xf32> to vector<2x32xf32>
    %270 = vector.extract_strided_slice %268 {offsets = [0, 32], sizes = [2, 32], strides = [1, 1]} : vector<2x128xf32> to vector<2x32xf32>
    %271 = vector.extract_strided_slice %268 {offsets = [0, 64], sizes = [2, 32], strides = [1, 1]} : vector<2x128xf32> to vector<2x32xf32>
    %272 = vector.extract_strided_slice %268 {offsets = [0, 96], sizes = [2, 32], strides = [1, 1]} : vector<2x128xf32> to vector<2x32xf32>
    %273 = arith.mulf %270, %230 : vector<2x32xf32>
    %274 = arith.mulf %269, %271 : vector<2x32xf32>
    %275 = arith.addf %273, %274 : vector<2x32xf32>
    %276 = math.tanh %275 : vector<2x32xf32>
    %277 = arith.mulf %272, %276 : vector<2x32xf32>
    %278 = tpu.concatenate %277, %252 in 1 : vector<2x32xf32>, vector<2x32xf32> -> vector<2x64xf32>
    %cst_72 = arith.constant dense<0.000000e+00> : vector<2x128xf32>
    %279 = tpu.matmul %278, %17, %cst_72 {dimension_numbers = #tpu.dot_dimension_numbers<[1], [0], [0], [1], [0, 0, 1, 1], [], []>} : vector<2x64xf32>, vector<64x128xf32>, vector<2x128xf32> -> vector<2x128xf32>
    %280 = vector.broadcast %8 : vector<1x128xf32> to vector<2x128xf32>
    %281 = arith.addf %279, %280 : vector<2x128xf32>
    %282 = math.tanh %281 : vector<2x128xf32>
    %283 = arith.negf %281 : vector<2x128xf32>
    %284 = math.exp %283 : vector<2x128xf32>
    %cst_73 = arith.constant 1.000000e+00 : f32
    %285 = vector.broadcast %cst_73 : f32 to vector<2x128xf32>
    %286 = arith.addf %285, %284 : vector<2x128xf32>
    %287 = arith.divf %285, %286 : vector<2x128xf32>
    %288 = arith.select %23, %282, %287 : vector<2x128xi1>, vector<2x128xf32>
    %289 = vector.extract_strided_slice %288 {offsets = [0, 0], sizes = [2, 32], strides = [1, 1]} : vector<2x128xf32> to vector<2x32xf32>
    %290 = vector.extract_strided_slice %288 {offsets = [0, 32], sizes = [2, 32], strides = [1, 1]} : vector<2x128xf32> to vector<2x32xf32>
    %291 = vector.extract_strided_slice %288 {offsets = [0, 64], sizes = [2, 32], strides = [1, 1]} : vector<2x128xf32> to vector<2x32xf32>
    %292 = vector.extract_strided_slice %288 {offsets = [0, 96], sizes = [2, 32], strides = [1, 1]} : vector<2x128xf32> to vector<2x32xf32>
    %293 = arith.mulf %290, %250 : vector<2x32xf32>
    %294 = arith.mulf %289, %291 : vector<2x32xf32>
    %295 = arith.addf %293, %294 : vector<2x32xf32>
    %296 = math.tanh %295 : vector<2x32xf32>
    %297 = arith.mulf %292, %296 : vector<2x32xf32>
    %298 = arith.index_cast %c5_i32 : i32 to index
    %c0_74 = arith.constant 0 : index
    %c0_75 = arith.constant 0 : index
    %299 = vector.load %arg10[%298, %c0_74, %c0_75] : memref<8x2x32xf32, #tpu.memory_space<vmem>>, vector<1x2x32xf32>
    %300 = vector.shape_cast %299 : vector<1x2x32xf32> to vector<2x32xf32>
    %301 = vector.shape_cast %297 : vector<2x32xf32> to vector<1x2x32xf32>
    tpu.vector_store %arg10[%298, %c0_74, %c0_75], %301 {strides = array<i32>} : memref<8x2x32xf32, #tpu.memory_space<vmem>>, vector<1x2x32xf32>,
    %c6_i32 = arith.constant 6 : i32
    %302 = arith.index_cast %c6_i32 : i32 to index
    %c0_76 = arith.constant 0 : index
    %c0_77 = arith.constant 0 : index
    %303 = vector.load %arg9[%302, %c0_76, %c0_77] : memref<8x2x128xf32, #tpu.memory_space<vmem>>, vector<1x2x128xf32>
    %304 = vector.shape_cast %303 : vector<1x2x128xf32> to vector<2x128xf32>
    %cst_78 = arith.constant dense<0.000000e+00> : vector<2x128xf32>
    %305 = tpu.matmul %277, %16, %cst_78 {dimension_numbers = #tpu.dot_dimension_numbers<[1], [0], [0], [1], [0, 0, 1, 1], [], []>} : vector<2x32xf32>, vector<32x128xf32>, vector<2x128xf32> -> vector<2x128xf32>
    %306 = arith.addf %304, %305 : vector<2x128xf32>
    %307 = math.tanh %306 : vector<2x128xf32>
    %308 = arith.negf %306 : vector<2x128xf32>
    %309 = math.exp %308 : vector<2x128xf32>
    %cst_79 = arith.constant 1.000000e+00 : f32
    %310 = vector.broadcast %cst_79 : f32 to vector<2x128xf32>
    %311 = arith.addf %310, %309 : vector<2x128xf32>
    %312 = arith.divf %310, %311 : vector<2x128xf32>
    %313 = arith.select %23, %307, %312 : vector<2x128xi1>, vector<2x128xf32>
    %314 = vector.extract_strided_slice %313 {offsets = [0, 0], sizes = [2, 32], strides = [1, 1]} : vector<2x128xf32> to vector<2x32xf32>
    %315 = vector.extract_strided_slice %313 {offsets = [0, 32], sizes = [2, 32], strides = [1, 1]} : vector<2x128xf32> to vector<2x32xf32>
    %316 = vector.extract_strided_slice %313 {offsets = [0, 64], sizes = [2, 32], strides = [1, 1]} : vector<2x128xf32> to vector<2x32xf32>
    %317 = vector.extract_strided_slice %313 {offsets = [0, 96], sizes = [2, 32], strides = [1, 1]} : vector<2x128xf32> to vector<2x32xf32>
    %318 = arith.mulf %315, %275 : vector<2x32xf32>
    %319 = arith.mulf %314, %316 : vector<2x32xf32>
    %320 = arith.addf %318, %319 : vector<2x32xf32>
    %321 = math.tanh %320 : vector<2x32xf32>
    %322 = arith.mulf %317, %321 : vector<2x32xf32>
    %323 = tpu.concatenate %322, %297 in 1 : vector<2x32xf32>, vector<2x32xf32> -> vector<2x64xf32>
    %cst_80 = arith.constant dense<0.000000e+00> : vector<2x128xf32>
    %324 = tpu.matmul %323, %17, %cst_80 {dimension_numbers = #tpu.dot_dimension_numbers<[1], [0], [0], [1], [0, 0, 1, 1], [], []>} : vector<2x64xf32>, vector<64x128xf32>, vector<2x128xf32> -> vector<2x128xf32>
    %325 = vector.broadcast %8 : vector<1x128xf32> to vector<2x128xf32>
    %326 = arith.addf %324, %325 : vector<2x128xf32>
    %327 = math.tanh %326 : vector<2x128xf32>
    %328 = arith.negf %326 : vector<2x128xf32>
    %329 = math.exp %328 : vector<2x128xf32>
    %cst_81 = arith.constant 1.000000e+00 : f32
    %330 = vector.broadcast %cst_81 : f32 to vector<2x128xf32>
    %331 = arith.addf %330, %329 : vector<2x128xf32>
    %332 = arith.divf %330, %331 : vector<2x128xf32>
    %333 = arith.select %23, %327, %332 : vector<2x128xi1>, vector<2x128xf32>
    %334 = vector.extract_strided_slice %333 {offsets = [0, 0], sizes = [2, 32], strides = [1, 1]} : vector<2x128xf32> to vector<2x32xf32>
    %335 = vector.extract_strided_slice %333 {offsets = [0, 32], sizes = [2, 32], strides = [1, 1]} : vector<2x128xf32> to vector<2x32xf32>
    %336 = vector.extract_strided_slice %333 {offsets = [0, 64], sizes = [2, 32], strides = [1, 1]} : vector<2x128xf32> to vector<2x32xf32>
    %337 = vector.extract_strided_slice %333 {offsets = [0, 96], sizes = [2, 32], strides = [1, 1]} : vector<2x128xf32> to vector<2x32xf32>
    %338 = arith.mulf %335, %295 : vector<2x32xf32>
    %339 = arith.mulf %334, %336 : vector<2x32xf32>
    %340 = arith.addf %338, %339 : vector<2x32xf32>
    %341 = math.tanh %340 : vector<2x32xf32>
    %342 = arith.mulf %337, %341 : vector<2x32xf32>
    %343 = arith.index_cast %c6_i32 : i32 to index
    %c0_82 = arith.constant 0 : index
    %c0_83 = arith.constant 0 : index
    %344 = vector.load %arg10[%343, %c0_82, %c0_83] : memref<8x2x32xf32, #tpu.memory_space<vmem>>, vector<1x2x32xf32>
    %345 = vector.shape_cast %344 : vector<1x2x32xf32> to vector<2x32xf32>
    %346 = vector.shape_cast %342 : vector<2x32xf32> to vector<1x2x32xf32>
    tpu.vector_store %arg10[%343, %c0_82, %c0_83], %346 {strides = array<i32>} : memref<8x2x32xf32, #tpu.memory_space<vmem>>, vector<1x2x32xf32>,
    %c7_i32 = arith.constant 7 : i32
    %347 = arith.index_cast %c7_i32 : i32 to index
    %c0_84 = arith.constant 0 : index
    %c0_85 = arith.constant 0 : index
    %348 = vector.load %arg9[%347, %c0_84, %c0_85] : memref<8x2x128xf32, #tpu.memory_space<vmem>>, vector<1x2x128xf32>
    %349 = vector.shape_cast %348 : vector<1x2x128xf32> to vector<2x128xf32>
    %cst_86 = arith.constant dense<0.000000e+00> : vector<2x128xf32>
    %350 = tpu.matmul %322, %16, %cst_86 {dimension_numbers = #tpu.dot_dimension_numbers<[1], [0], [0], [1], [0, 0, 1, 1], [], []>} : vector<2x32xf32>, vector<32x128xf32>, vector<2x128xf32> -> vector<2x128xf32>
    %351 = arith.addf %349, %350 : vector<2x128xf32>
    %352 = math.tanh %351 : vector<2x128xf32>
    %353 = arith.negf %351 : vector<2x128xf32>
    %354 = math.exp %353 : vector<2x128xf32>
    %cst_87 = arith.constant 1.000000e+00 : f32
    %355 = vector.broadcast %cst_87 : f32 to vector<2x128xf32>
    %356 = arith.addf %355, %354 : vector<2x128xf32>
    %357 = arith.divf %355, %356 : vector<2x128xf32>
    %358 = arith.select %23, %352, %357 : vector<2x128xi1>, vector<2x128xf32>
    %359 = vector.extract_strided_slice %358 {offsets = [0, 0], sizes = [2, 32], strides = [1, 1]} : vector<2x128xf32> to vector<2x32xf32>
    %360 = vector.extract_strided_slice %358 {offsets = [0, 32], sizes = [2, 32], strides = [1, 1]} : vector<2x128xf32> to vector<2x32xf32>
    %361 = vector.extract_strided_slice %358 {offsets = [0, 64], sizes = [2, 32], strides = [1, 1]} : vector<2x128xf32> to vector<2x32xf32>
    %362 = vector.extract_strided_slice %358 {offsets = [0, 96], sizes = [2, 32], strides = [1, 1]} : vector<2x128xf32> to vector<2x32xf32>
    %363 = arith.mulf %360, %320 : vector<2x32xf32>
    %364 = arith.mulf %359, %361 : vector<2x32xf32>
    %365 = arith.addf %363, %364 : vector<2x32xf32>
    %366 = math.tanh %365 : vector<2x32xf32>
    %367 = arith.mulf %362, %366 : vector<2x32xf32>
    %368 = tpu.concatenate %367, %342 in 1 : vector<2x32xf32>, vector<2x32xf32> -> vector<2x64xf32>
    %cst_88 = arith.constant dense<0.000000e+00> : vector<2x128xf32>
    %369 = tpu.matmul %368, %17, %cst_88 {dimension_numbers = #tpu.dot_dimension_numbers<[1], [0], [0], [1], [0, 0, 1, 1], [], []>} : vector<2x64xf32>, vector<64x128xf32>, vector<2x128xf32> -> vector<2x128xf32>
    %370 = vector.broadcast %8 : vector<1x128xf32> to vector<2x128xf32>
    %371 = arith.addf %369, %370 : vector<2x128xf32>
    %372 = math.tanh %371 : vector<2x128xf32>
    %373 = arith.negf %371 : vector<2x128xf32>
    %374 = math.exp %373 : vector<2x128xf32>
    %cst_89 = arith.constant 1.000000e+00 : f32
    %375 = vector.broadcast %cst_89 : f32 to vector<2x128xf32>
    %376 = arith.addf %375, %374 : vector<2x128xf32>
    %377 = arith.divf %375, %376 : vector<2x128xf32>
    %378 = arith.select %23, %372, %377 : vector<2x128xi1>, vector<2x128xf32>
    %379 = vector.extract_strided_slice %378 {offsets = [0, 0], sizes = [2, 32], strides = [1, 1]} : vector<2x128xf32> to vector<2x32xf32>
    %380 = vector.extract_strided_slice %378 {offsets = [0, 32], sizes = [2, 32], strides = [1, 1]} : vector<2x128xf32> to vector<2x32xf32>
    %381 = vector.extract_strided_slice %378 {offsets = [0, 64], sizes = [2, 32], strides = [1, 1]} : vector<2x128xf32> to vector<2x32xf32>
    %382 = vector.extract_strided_slice %378 {offsets = [0, 96], sizes = [2, 32], strides = [1, 1]} : vector<2x128xf32> to vector<2x32xf32>
    %383 = arith.mulf %380, %340 : vector<2x32xf32>
    %384 = arith.mulf %379, %381 : vector<2x32xf32>
    %385 = arith.addf %383, %384 : vector<2x32xf32>
    %386 = math.tanh %385 : vector<2x32xf32>
    %387 = arith.mulf %382, %386 : vector<2x32xf32>
    %388 = arith.index_cast %c7_i32 : i32 to index
    %c0_90 = arith.constant 0 : index
    %c0_91 = arith.constant 0 : index
    %389 = vector.load %arg10[%388, %c0_90, %c0_91] : memref<8x2x32xf32, #tpu.memory_space<vmem>>, vector<1x2x32xf32>
    %390 = vector.shape_cast %389 : vector<1x2x32xf32> to vector<2x32xf32>
    %391 = vector.shape_cast %387 : vector<2x32xf32> to vector<1x2x32xf32>
    tpu.vector_store %arg10[%388, %c0_90, %c0_91], %391 {strides = array<i32>} : memref<8x2x32xf32, #tpu.memory_space<vmem>>, vector<1x2x32xf32>,
    %c8_i32 = arith.constant 8 : i32
    %c0_92 = arith.constant 0 : index
    %c0_93 = arith.constant 0 : index
    %c0_94 = arith.constant 0 : index
    %392 = vector.load %arg10[%c0_92, %c0_93, %c0_94] : memref<8x2x32xf32, #tpu.memory_space<vmem>>, vector<8x2x32xf32>
    %c0_95 = arith.constant 0 : index
    %c0_96 = arith.constant 0 : index
    %c0_97 = arith.constant 0 : index
    %393 = vector.load %arg6[%c0_95, %c0_96, %c0_97] : memref<1x1x32xf32, #tpu.memory_space<vmem>>, vector<1x1x32xf32>
    %394 = vector.broadcast %393 : vector<1x1x32xf32> to vector<8x2x32xf32>
    %395 = arith.mulf %392, %394 : vector<8x2x32xf32>
    %cst_98 = arith.constant dense<0.000000e+00> : vector<8x2xf32>
    %396 = vector.multi_reduction <add>, %395, %cst_98 [2] : vector<8x2x32xf32> to vector<8x2xf32>
    %c0_99 = arith.constant 0 : index
    %c0_100 = arith.constant 0 : index
    %397 = vector.load %arg7[%c0_99, %c0_100] : memref<1x1xf32, #tpu.memory_space<vmem>>, vector<1x1xf32>
    %398 = vector.broadcast %397 : vector<1x1xf32> to vector<8x2xf32>
    %399 = arith.addf %396, %398 : vector<8x2xf32>
    %c0_101 = arith.constant 0 : index
    %c0_102 = arith.constant 0 : index
    %400 = vector.load %arg8[%c0_101, %c0_102] : memref<8x2xf32, #tpu.memory_space<vmem>>, vector<8x2xf32>
    tpu.vector_store %arg8[%c0_101, %c0_102], %399 {strides = array<i32>} : memref<8x2xf32, #tpu.memory_space<vmem>>, vector<8x2xf32>,
    return
  }
  func.func @transform_0(%arg0: i32) -> (i32, i32, i32) {
    %c0_i32 = arith.constant 0 : i32
    %c0_i32_0 = arith.constant 0 : i32
    %c0_i32_1 = arith.constant 0 : i32
    %c0_i32_2 = arith.constant 0 : i32
    return %c0_i32, %c0_i32_0, %c0_i32_1 : i32, i32, i32
  }
  func.func @transform_1(%arg0: i32) -> (i32, i32, i32, i32) {
    %c0_i32 = arith.constant 0 : i32
    %c0_i32_0 = arith.constant 0 : i32
    %c0_i32_1 = arith.constant 0 : i32
    %c0_i32_2 = arith.constant 0 : i32
    %c0_i32_3 = arith.constant 0 : i32
    return %c0_i32, %c0_i32_0, %c0_i32_1, %c0_i32_2 : i32, i32, i32, i32
  }
  func.func @transform_2(%arg0: i32) -> (i32, i32) {
    %c0_i32 = arith.constant 0 : i32
    %c0_i32_0 = arith.constant 0 : i32
    %c0_i32_1 = arith.constant 0 : i32
    return %c0_i32, %c0_i32_0 : i32, i32
  }
  func.func @transform_3(%arg0: i32) -> (i32, i32) {
    %c0_i32 = arith.constant 0 : i32
    %c0_i32_0 = arith.constant 0 : i32
    %c0_i32_1 = arith.constant 0 : i32
    return %c0_i32, %c0_i32_0 : i32, i32
  }
  func.func @transform_4(%arg0: i32) -> (i32, i32) {
    %c0_i32 = arith.constant 0 : i32
    %c0_i32_0 = arith.constant 0 : i32
    %c0_i32_1 = arith.constant 0 : i32
    return %c0_i32, %c0_i32_0 : i32, i32
  }
  func.func @transform_5(%arg0: i32) -> (i32, i32, i32) {
    %c0_i32 = arith.constant 0 : i32
    %c0_i32_0 = arith.constant 0 : i32
    %c0_i32_1 = arith.constant 0 : i32
    %c0_i32_2 = arith.constant 0 : i32
    return %c0_i32, %c0_i32_0, %c0_i32_1 : i32, i32, i32
  }
  func.func @transform_6(%arg0: i32) -> (i32, i32) {
    %c0_i32 = arith.constant 0 : i32
    %c0_i32_0 = arith.constant 0 : i32
    %c0_i32_1 = arith.constant 0 : i32
    return %c0_i32, %c0_i32_0 : i32, i32
  }
  func.func @transform_7(%arg0: i32) -> (i32, i32) {
    %c0_i32 = arith.constant 0 : i32
    %c0_i32_0 = arith.constant 0 : i32
    %c0_i32_1 = arith.constant 0 : i32
    return %c0_i32, %c0_i32_0 : i32, i32
  }
}

</mosaic_0001>

<bundles_post_ra>
// kernel: _generator_forward_impl.1
= control target key start
LH: loop header
LB: loop body
LE: loop exit
PB: predicated region body
PF: predicated region fallthrough
CT: control target
= control target key end

     0   :  { %v2646_v0 = vmov 0.0|0.0   ;;  %vm2647_vm0 = vmmov 0   ;;  %v2648_v4 = vmov 0.0   ;;  %v2649_v7 = vmov 0   ;;  %s2651_s19 = smov 64   ;;  %s3189_s3 = inlined_call_operand.vmem [shape: f32[32,128], index: 3, kind: input, shape index: {}]   ;;  %s3190_s0 = inlined_call_operand.vmem [shape: f32[8,2,1], index: 0, kind: input, shape index: {}]   ;;  %s3191_s1 = inlined_call_operand.vmem [shape: f32[2,2,2,32], index: 1, kind: input, shape index: {}]   ;;  %s3192_s2 = inlined_call_operand.vmem [shape: f32[3,128], index: 2, kind: input, shape index: {}]   ;;  %s3193_s4 = inlined_call_operand.vmem [shape: f32[64,128], index: 4, kind: input, shape index: {}]   ;;  %s3194_s5 = inlined_call_operand.vmem [shape: f32[1,1,32], index: 5, kind: input, shape index: {}]   ;;  %s3195_s6 = inlined_call_operand.<no memory space> [shape: f32[1,1], index: 6, kind: input, shape index: {}]   ;;  %s3196_s7 = inlined_call_operand.vmem [shape: f32[8,2], index: 7, kind: output, shape index: {}]  }
   0x1   :  { %2364 = vmatprep.subr.bf16.mxu1 %v2646_v0  ;;  %v111_v1 = vld [vmem:[%s3189_s3] sm:$0xff]  ;;  %v112_v2 = vld [vmem:[%s3189_s3 + $0x8] sm:$0xff]  ;;  %v113_v3 = vld [vmem:[%s3189_s3 + $0x10] sm:$0xff]  ;;  %2132 = vmatprep.mubr.msk.f32.mxu1 %vm2647_vm0, %v2648_v4  ;;  %vm136_vm1 = vcmask 261120   ;;  %v123_v23 = vlaneseq  ;;  %vm253_vm5 = vcmask 523264   ;;  %vm360_vm6 = vcmask 254976  }
   0x2   :  { %v2704_v5 = vpack.c.bf16 %v112_v2, %v111_v1  ;;  %v114_v6 = vld [vmem:[%s3189_s3 + $0x18] sm:$0xff]  ;;  %2514 = vset.pattern.permute.xlu0 %v2649_v7  ;;  %v31_v8 = vld [vmem:[%s3190_s0] sm:$0x3]  ;;  %2382 = vmatprep.subr.bf16.mxu0 %v2646_v0  ;;  %v1974_v9 = vld [vmem:[%s3191_s1 + $0x4] sm:$0x3]  ;;  %s2650_s3 = smov 32  }
   0x3   :  { %41 = vperm.xlu0 %2514, %v31_v8   ;;  %2162 = vmatprep.mubr.msk.f32.mxu0 %vm2647_vm0, %v2648_v4  ;;  %v2719_v10 = vpack.c.bf16 %v114_v6, %v113_v3  ;;  %v128_v11 = vld [vmem:[%s3191_s1] sm:$0x3]  ;;  %v2748_v25 = vand.u32 127, %v123_v23  ;;  %v116_v37 = vld [vmem:[%s3193_s4 + $0x8] sm:$0xff]  ;;  %v117_v38 = vld [vmem:[%s3193_s4 + $0x10] sm:$0xff]  ;;  %vm1951_vm7 = vcmask 1041409  }
   0x4   :  { %2366 = vmatpush3.bf16.msra.mxu1 %v2704_v5  ;;  %220 = vrot.lane.b32.xlu1 %v1974_v9, %s2650_s3  ;;  %v2738_v12 = vld [vmem:[%s3192_s2] ss:$0 sm:$0xff]  ;;  %v2743_v13 = vld [vmem:[%s3192_s2 + $0x1] ss:$0 sm:$0xff]  ;;  %v118_v40 = vld [vmem:[%s3193_s4 + $0x18] sm:$0xff]  ;;  %vm1953_vm8 = vcmask 1042434  }
   0x5   :  { %2367 = vmatprep.subr.bf16.mxu1 %v2646_v0  ;;  %2384 = vmatpush3.bf16.msra.mxu0 %v2704_v5  ;;  %vm125_vm2 = vcmp.ge.s32.totalorder %v2748_v25, 64  ;;  %vm126_vm3 = vcmp.lt.s32.totalorder %v2748_v25, 96  ;;  %v115_v36 = vld [vmem:[%s3193_s4] sm:$0xff]  ;;  %v2778_v41 = vpack.c.bf16 %v118_v40, %v117_v38  ;;  %v120_v43 = vld [vmem:[%s3193_s4 + $0x28] sm:$0xff]  ;;  %v121_v45 = vld [vmem:[%s3193_s4 + $0x30] sm:$0xff]  ;;  %vm1955_vm9 = vcmask 1043459  }
   0x6   :  { %2385 = vmatprep.subr.bf16.mxu0 %v2646_v0  ;;  %2515 = vset.pattern.permute.xlu1 %v2649_v7  ;;  %vm2752_vm4 = vmand %vm125_vm2, %vm126_vm3  ;;  %v2772_v39 = vpack.c.bf16 %v116_v37, %v115_v36  ;;  %v119_v42 = vld [vmem:[%s3193_s4 + $0x20] sm:$0xff]  ;;  %v122_v46 = vld [vmem:[%s3193_s4 + $0x38] sm:$0xff]  ;;  %vm1957_vm10 = vcmask 1044484   ;;  %vm1959_vm11 = vcmask 1045509   ;;  %vm1961_vm12 = vcmask 1046534  }
   0x7   :  { %v2788_v44 = vpack.c.bf16 %v120_v43, %v119_v42  ;;  %v1975_v48 = vld [vmem:[%s3191_s1 + $0x2] sm:$0x3]  ;;  %v2802_v49 = vpack.c.bf16 %v122_v46, %v121_v45  ;;  %v33_v45 = vld [vmem:[%s3190_s0 + $0x4] sm:$0x3]  ;;  %vm1963_vm13 = vcmask 1047559   ;;  %vm1966_vm14 = vcmask 15360  }
   0x8   :  { %2369 = vmatpush3.bf16.msra.mxu1 %v2719_v10  ;;  %v32_v52 = vld [vmem:[%s3190_s0 + $0x2] sm:$0x3] }
   0x9   :  { %2370 = vmatprep.subr.bf16.mxu1 %v2646_v0  ;;  %2387 = vmatpush3.bf16.msra.mxu0 %v2719_v10  ;;  %v2836_v60 = vld [vmem:[%s3192_s2 + $0x2] ss:$0 sm:$0xff] }
   0xa   :  { %2388 = vmatprep.subr.bf16.mxu0 %v2646_v0 }
   0xb   :  { %2133 = vmatmul.mubr.msk.f32.vlgmr.msra.gmra.mrb[0].mxu1 %vm136_vm1, %v128_v11 }
   0xc   :  { %2151 = vmatprep.mubr.msk.f32.mxu1 %vm2647_vm0, %v2648_v4  ;;  %2372 = vmatpush3.bf16.msra.mxu1 %v2772_v39 }
   0xd   :  { %2373 = vmatprep.subr.bf16.mxu1 %v2646_v0 }
  0x10   :  { %2375 = vmatpush3.bf16.msra.mxu1 %v2778_v41 }
  0x11   :  { %2376 = vmatprep.subr.bf16.mxu1 %v2646_v0 }
  0x14   :  { %2378 = vmatpush3.bf16.msra.mxu1 %v2788_v44 }
  0x15   :  { %2379 = vmatprep.subr.bf16.mxu1 %v2646_v0 }
  0x18   :  { %2381 = vmatpush3.bf16.msra.mxu1 %v2802_v49 }
  0x19   :  { %2400 = vmatprep.subr.bf16.mxu1 %v2646_v0 }
  0x76   :  { %v221_v32 = vpop.permute.xlu1 %220 }
  0x82   :  { %v42_v14 = vpop.permute.xlu0 %41 }
  0x83   :  { %v83_v15 = vmul.f32 %v2738_v12, %v42_v14 }
  0x85   :  { %v95_v16 = vadd.f32 %v2743_v13, %v83_v15 }
  0x87   :  { %103 = vst [vmem:[#allocation2] sm:$0x3] %v95_v16 }
  0x8e   :  { %v135_v17 = vld [vmem:[#allocation2] sm:$0x3] }
  0xde   :  { %v206_v18 = vpop.f32.mrb[0].mxu1 }
  0xdf   :  { %v210_v19 = vadd.f32 %v206_v18, %v135_v17  ;;  %v2134_v20 = vpop.f32.mrb[1].mxu1 }
  0xe1   :  { %v1978_v21 = vmul.f32 -1.442695, %v210_v19 }
  0xe3   :  { %2516 = vpow2.f32 %v1978_v21  ;;  %v1976_v21 = vld [vmem:[%s3191_s1 + $0x6] sm:$0x3] }
  0xe4   :  { %2518 = vtanh.f32 %v210_v19 }
  0xed   :  { %v2517_v22 = vpop.eup %2516 }
  0xee   :  { %v215_v24 = vadd.f32 1.0, %v2517_v22  ;;  %v2519_v27 = vpop.eup %2518 }
  0xf0   :  { %2520 = vrcp.f32 %v215_v24 }
  0xfa   :  { %v2521_v28 = vpop.eup %2520 }
  0xfb   :  { %v218_v29 = vsel %vm2752_vm4, %v2519_v27, %v2521_v28 }
  0xfc   :  { %225 = vrot.lane.b32.xlu0 %v218_v29, %s2651_s19  ;;  %v223_v33 = vmul.f32 %v221_v32, %v218_v29 }
 0x16e   :  { %v226_v30 = vpop.permute.xlu0 %225 }
 0x16f   :  { %v228_v31 = vmul.f32 %v226_v30, %v218_v29 }
 0x171   :  { %230 = vrot.lane.b32.xlu1 %v228_v31, %s2650_s3 }
 0x1e3   :  { %v231_v34 = vpop.permute.xlu1 %230 }
 0x1e4   :  { %v2760_v35 = vadd.f32 %v231_v34, %v223_v33 }
 0x1e6   :  { %2522 = vtanh.f32 %v2760_v35 }
 0x1f0   :  { %v2523_v47 = vpop.eup %2522 }
 0x1f1   :  { %236 = vrot.lane.b32.xlu0 %v2523_v47, %s2651_s19 }
 0x1f5   :  { %245 = vrot.lane.b32.xlu0 %v1975_v48, %s2650_s3 }
 0x263   :  { %v237_v50 = vpop.permute.xlu0 %236 }
 0x264   :  { %v239_v51 = vmul.f32 %v237_v50, %v218_v29 }
 0x266   :  { %241 = vrot.lane.b32.xlu1 %v239_v51, %s2650_s3 }
 0x267   :  { %v246_v53 = vpop.permute.xlu0 %245 }
 0x26a   :  { %46 = vperm.xlu1 %2515, %v32_v52  }
 0x2d8   :  { %v242_v54 = vpop.permute.xlu1 %241 }
 0x2d9   :  { %v248_v55 = vsel %vm136_vm1, %v242_v54, %v246_v53  ;;  %2163 = vmatmul.mubr.msk.f32.vlgmr.msra.gmra.mrb[0].mxu0 %vm136_vm1, %v242_v54 }
 0x2da   :  { %2152 = vmatmul.mubr.msk.f32.vlgmr.msra.gmra.mrb[2].mxu1 %vm253_vm5, %v248_v55  ;;  %2390 = vmatpush3.bf16.msra.mxu0 %v2772_v39 }
 0x2db   :  { %2391 = vmatprep.subr.bf16.mxu0 %v2646_v0  ;;  %2402 = vmatpush3.bf16.msra.mxu1 %v2704_v5 }
 0x2dc   :  { %2403 = vmatprep.subr.bf16.mxu1 %v2646_v0  ;;  %2192 = vmatprep.mubr.msk.f32.mxu1 %vm2647_vm0, %v2648_v4 }
 0x2dd   :  { %2181 = vmatprep.mubr.msk.f32.mxu0 %vm2647_vm0, %v2648_v4 }
 0x2de   :  { %2393 = vmatpush3.bf16.msra.mxu0 %v2778_v41 }
 0x2df   :  { %2394 = vmatprep.subr.bf16.mxu0 %v2646_v0  ;;  %2405 = vmatpush3.bf16.msra.mxu1 %v2719_v10 }
 0x2e0   :  { %2406 = vmatprep.subr.bf16.mxu1 %v2646_v0 }
 0x2e2   :  { %2396 = vmatpush3.bf16.msra.mxu0 %v2788_v44 }
 0x2e3   :  { %2397 = vmatprep.subr.bf16.mxu0 %v2646_v0 }
 0x2e6   :  { %2399 = vmatpush3.bf16.msra.mxu0 %v2802_v49 }
 0x2e7   :  { %2418 = vmatprep.subr.bf16.mxu0 %v2646_v0 }
 0x2e9   :  { %v47_v56 = vpop.permute.xlu1 %46 }
 0x2ea   :  { %v84_v57 = vmul.f32 %v2738_v12, %v47_v56 }
 0x2ec   :  { %v96_v58 = vadd.f32 %v2743_v13, %v84_v57 }
 0x2ee   :  { %104 = vst [vmem:[#allocation2 + $0x2] sm:$0x3] %v96_v58 }
 0x2f5   :  { %v363_v59 = vld [vmem:[#allocation2 + $0x2] sm:$0x3] }
 0x3ac   :  { %v432_v61 = vpop.f32.mrb[0].mxu0 }
 0x3ad   :  { %v436_v62 = vadd.f32 %v432_v61, %v363_v59  ;;  %v323_v63 = vpop.f32.mrb[2].mxu1  ;;  %v2164_v1 = vpop.f32.mrb[1].mxu0 }
 0x3ae   :  { %v324_v2 = vadd.f32 %v2836_v60, %v323_v63  ;;  %v2153_v3 = vpop.f32.mrb[3].mxu1 }
 0x3af   :  { %v1983_v6 = vmul.f32 -1.442695, %v436_v62 }
 0x3b0   :  { %v1981_v7 = vmul.f32 -1.442695, %v324_v2 }
 0x3b1   :  { %2524 = vpow2.f32 %v1983_v6 }
 0x3b2   :  { %2526 = vpow2.f32 %v1981_v7 }
 0x3b3   :  { %2528 = vtanh.f32 %v436_v62 }
 0x3b4   :  { %2530 = vtanh.f32 %v324_v2 }
 0x3bb   :  { %v2525_v8 = vpop.eup %2524 }
 0x3bc   :  { %v2527_v9 = vpop.eup %2526  ;;  %v441_v11 = vadd.f32 1.0, %v2525_v8 }
 0x3bd   :  { %v331_v14 = vadd.f32 1.0, %v2527_v9  ;;  %v2529_v15 = vpop.eup %2528 }
 0x3be   :  { %2532 = vrcp.f32 %v441_v11  ;;  %v2531_v16 = vpop.eup %2530 }
 0x3bf   :  { %2534 = vrcp.f32 %v331_v14 }
 0x3c8   :  { %v2533_v17 = vpop.eup %2532 }
 0x3c9   :  { %v2535_v18 = vpop.eup %2534  ;;  %v444_v19 = vsel %vm2752_vm4, %v2529_v15, %v2533_v17 }
 0x3ca   :  { %447 = vrot.lane.b32.xlu1 %v444_v19, %s2651_s19  ;;  %v334_v20 = vsel %vm2752_vm4, %v2531_v16, %v2535_v18  ;;  %v445_v30 = vmul.f32 %v444_v19, %v2760_v35 }
 0x3cb   :  { %341 = vrot.lane.b32.xlu0 %v334_v20, %s2651_s19 }
 0x3cf   :  { %336 = vrot.lane.b32.xlu0 %v1976_v21, %s2650_s3 }
 0x43c   :  { %v448_v22 = vpop.permute.xlu1 %447 }
 0x43d   :  { %v450_v24 = vmul.f32 %v448_v22, %v444_v19  ;;  %v342_v27 = vpop.permute.xlu0 %341 }
 0x43e   :  { %v344_v28 = vmul.f32 %v342_v27, %v334_v20 }
 0x43f   :  { %452 = vrot.lane.b32.xlu0 %v450_v24, %s2650_s3 }
 0x440   :  { %346 = vrot.lane.b32.xlu1 %v344_v28, %s2650_s3 }
 0x441   :  { %v337_v29 = vpop.permute.xlu0 %336 }
 0x442   :  { %v339_v31 = vmul.f32 %v337_v29, %v334_v20 }
 0x4b1   :  { %v453_v32 = vpop.permute.xlu0 %452 }
 0x4b2   :  { %v2852_v33 = vadd.f32 %v453_v32, %v445_v30  ;;  %v347_v34 = vpop.permute.xlu1 %346 }
 0x4b3   :  { %v2854_v36 = vadd.f32 %v347_v34, %v339_v31  ;;  %v34_v34 = vld [vmem:[%s3190_s0 + $0x6] sm:$0x3] }
 0x4b4   :  { %2536 = vtanh.f32 %v2852_v33 }
 0x4b5   :  { %2538 = vtanh.f32 %v2854_v36 }
 0x4be   :  { %v2537_v37 = vpop.eup %2536 }
 0x4bf   :  { %v2539_v38 = vpop.eup %2538  ;;  %458 = vrot.lane.b32.xlu0 %v2537_v37, %s2651_s19 }
 0x4c0   :  { %352 = vrot.lane.b32.xlu1 %v2539_v38, %s2651_s19 }
 0x531   :  { %v459_v40 = vpop.permute.xlu0 %458 }
 0x532   :  { %v461_v42 = vmul.f32 %v459_v40, %v444_v19  ;;  %v353_v35 = vpop.permute.xlu1 %352 }
 0x533   :  { %v2860_v43 = vmul.f32 %v353_v35, %v334_v20 }
 0x534   :  { %463 = vrot.lane.b32.xlu1 %v461_v42, %s2650_s3 }
 0x535   :  { %466 = vrot.lane.b32.xlu0 %v2860_v43, %s2651_s19 }
 0x538   :  { %51 = vperm.xlu1 %2515, %v33_v45  }
 0x5a6   :  { %v464_v46 = vpop.permute.xlu1 %463 }
 0x5a7   :  { %2193 = vmatmul.mubr.msk.f32.vlgmr.msra.gmra.mrb[4].mxu1 %vm136_vm1, %v464_v46  ;;  %v467_v47 = vpop.permute.xlu0 %466 }
 0x5a8   :  { %v469_v48 = vsel %vm136_vm1, %v464_v46, %v467_v47  ;;  %2408 = vmatpush3.bf16.msra.mxu1 %v2772_v39  ;;  %2211 = vmatprep.mubr.msk.f32.mxu1 %vm2647_vm0, %v2648_v4 }
 0x5a9   :  { %2182 = vmatmul.mubr.msk.f32.vlgmr.msra.gmra.mrb[2].mxu0 %vm253_vm5, %v469_v48  ;;  %2409 = vmatprep.subr.bf16.mxu1 %v2646_v0 }
 0x5aa   :  { %2420 = vmatpush3.bf16.msra.mxu0 %v2704_v5  ;;  %2222 = vmatprep.mubr.msk.f32.mxu0 %vm2647_vm0, %v2648_v4 }
 0x5ab   :  { %2421 = vmatprep.subr.bf16.mxu0 %v2646_v0 }
 0x5ac   :  { %2411 = vmatpush3.bf16.msra.mxu1 %v2778_v41 }
 0x5ad   :  { %2412 = vmatprep.subr.bf16.mxu1 %v2646_v0 }
 0x5ae   :  { %2423 = vmatpush3.bf16.msra.mxu0 %v2719_v10 }
 0x5af   :  { %2424 = vmatprep.subr.bf16.mxu0 %v2646_v0 }
 0x5b0   :  { %2414 = vmatpush3.bf16.msra.mxu1 %v2788_v44 }
 0x5b1   :  { %2415 = vmatprep.subr.bf16.mxu1 %v2646_v0 }
 0x5b4   :  { %2417 = vmatpush3.bf16.msra.mxu1 %v2802_v49 }
 0x5b5   :  { %2436 = vmatprep.subr.bf16.mxu1 %v2646_v0 }
 0x5b7   :  { %v52_v50 = vpop.permute.xlu1 %51 }
 0x5b8   :  { %v85_v51 = vmul.f32 %v2738_v12, %v52_v50 }
 0x5ba   :  { %v97_v52 = vadd.f32 %v2743_v13, %v85_v51 }
 0x5bc   :  { %105 = vst [vmem:[#allocation2 + $0x4] sm:$0x3] %v97_v52 }
 0x5c3   :  { %v575_v53 = vld [vmem:[#allocation2 + $0x4] sm:$0x3] }
 0x67a   :  { %v644_v54 = vpop.f32.mrb[4].mxu1 }
 0x67b   :  { %v648_v55 = vadd.f32 %v644_v54, %v575_v53  ;;  %v2194_v56 = vpop.f32.mrb[5].mxu1 }
 0x67c   :  { %v539_v57 = vpop.f32.mrb[2].mxu0 }
 0x67d   :  { %v1987_v58 = vmul.f32 -1.442695, %v648_v55  ;;  %v540_v59 = vadd.f32 %v2836_v60, %v539_v57  ;;  %v2183_v61 = vpop.f32.mrb[3].mxu0 }
 0x67f   :  { %2540 = vpow2.f32 %v1987_v58  ;;  %v1985_v62 = vmul.f32 -1.442695, %v540_v59 }
 0x681   :  { %2542 = vpow2.f32 %v1985_v62 }
 0x682   :  { %2544 = vtanh.f32 %v648_v55 }
 0x689   :  { %v2541_v63 = vpop.eup %2540 }
 0x68a   :  { %v653_v1 = vadd.f32 1.0, %v2541_v63 }
 0x68b   :  { %v2543_v2 = vpop.eup %2542 }
 0x68c   :  { %2546 = vrcp.f32 %v653_v1  ;;  %v547_v3 = vadd.f32 1.0, %v2543_v2  ;;  %v2545_v6 = vpop.eup %2544 }
 0x68d   :  { %2548 = vtanh.f32 %v540_v59 }
 0x68e   :  { %2550 = vrcp.f32 %v547_v3 }
 0x696   :  { %v2547_v7 = vpop.eup %2546 }
 0x697   :  { %v2549_v8 = vpop.eup %2548  ;;  %v656_v9 = vsel %vm2752_vm4, %v2545_v6, %v2547_v7 }
 0x698   :  { %v2551_v11 = vpop.eup %2550  ;;  %659 = vrot.lane.b32.xlu1 %v656_v9, %s2651_s19  ;;  %v657_v19 = vmul.f32 %v656_v9, %v2852_v33 }
 0x699   :  { %v550_v14 = vsel %vm2752_vm4, %v2549_v8, %v2551_v11 }
 0x69a   :  { %553 = vrot.lane.b32.xlu0 %v550_v14, %s2651_s19  ;;  %v551_v22 = vmul.f32 %v550_v14, %v2854_v36 }
 0x70a   :  { %v660_v15 = vpop.permute.xlu1 %659 }
 0x70b   :  { %v662_v16 = vmul.f32 %v660_v15, %v656_v9 }
 0x70c   :  { %v554_v17 = vpop.permute.xlu0 %553 }
 0x70d   :  { %v556_v18 = vmul.f32 %v554_v17, %v550_v14  ;;  %664 = vrot.lane.b32.xlu1 %v662_v16, %s2650_s3 }
 0x70f   :  { %558 = vrot.lane.b32.xlu0 %v556_v18, %s2650_s3 }
 0x77f   :  { %v665_v20 = vpop.permute.xlu1 %664 }
 0x780   :  { %v2899_v21 = vadd.f32 %v665_v20, %v657_v19 }
 0x781   :  { %v559_v24 = vpop.permute.xlu0 %558 }
 0x782   :  { %2552 = vtanh.f32 %v2899_v21  ;;  %v2903_v27 = vadd.f32 %v559_v24, %v551_v22 }
 0x784   :  { %2554 = vtanh.f32 %v2903_v27 }
 0x78c   :  { %v2553_v28 = vpop.eup %2552 }
 0x78d   :  { %670 = vrot.lane.b32.xlu1 %v2553_v28, %s2651_s19 }
 0x78e   :  { %v2555_v29 = vpop.eup %2554 }
 0x78f   :  { %564 = vrot.lane.b32.xlu0 %v2555_v29, %s2651_s19 }
 0x7ff   :  { %v671_v30 = vpop.permute.xlu1 %670 }
 0x800   :  { %v673_v31 = vmul.f32 %v671_v30, %v656_v9 }
 0x801   :  { %v565_v32 = vpop.permute.xlu0 %564 }
 0x802   :  { %v2908_v33 = vmul.f32 %v565_v32, %v550_v14  ;;  %675 = vrot.lane.b32.xlu0 %v673_v31, %s2650_s3 }
 0x804   :  { %678 = vrot.lane.b32.xlu1 %v2908_v33, %s2651_s19 }
 0x806   :  { %56 = vperm.xlu0 %2514, %v34_v34  }
 0x874   :  { %v676_v36 = vpop.permute.xlu0 %675 }
 0x875   :  { %2223 = vmatmul.mubr.msk.f32.vlgmr.msra.gmra.mrb[4].mxu0 %vm136_vm1, %v676_v36 }
 0x876   :  { %v679_v37 = vpop.permute.xlu1 %678  ;;  %2426 = vmatpush3.bf16.msra.mxu0 %v2772_v39  ;;  %2241 = vmatprep.mubr.msk.f32.mxu0 %vm2647_vm0, %v2648_v4 }
 0x877   :  { %v681_v38 = vsel %vm136_vm1, %v676_v36, %v679_v37  ;;  %2427 = vmatprep.subr.bf16.mxu0 %v2646_v0 }
 0x878   :  { %2212 = vmatmul.mubr.msk.f32.vlgmr.msra.gmra.mrb[6].mxu1 %vm253_vm5, %v681_v38 }
 0x879   :  { %2438 = vmatpush3.bf16.msra.mxu1 %v2704_v5  ;;  %2252 = vmatprep.mubr.msk.f32.mxu1 %vm2647_vm0, %v2648_v4 }
 0x87a   :  { %2429 = vmatpush3.bf16.msra.mxu0 %v2778_v41  ;;  %2439 = vmatprep.subr.bf16.mxu1 %v2646_v0 }
 0x87b   :  { %2430 = vmatprep.subr.bf16.mxu0 %v2646_v0 }
 0x87d   :  { %2441 = vmatpush3.bf16.msra.mxu1 %v2719_v10 }
 0x87e   :  { %2432 = vmatpush3.bf16.msra.mxu0 %v2788_v44  ;;  %2442 = vmatprep.subr.bf16.mxu1 %v2646_v0 }
 0x87f   :  { %2433 = vmatprep.subr.bf16.mxu0 %v2646_v0 }
 0x882   :  { %2435 = vmatpush3.bf16.msra.mxu0 %v2802_v49 }
 0x883   :  { %2454 = vmatprep.subr.bf16.mxu0 %v2646_v0 }
 0x885   :  { %v57_v40 = vpop.permute.xlu0 %56 }
 0x886   :  { %v86_v42 = vmul.f32 %v2738_v12, %v57_v40 }
 0x888   :  { %v98_v35 = vadd.f32 %v2743_v13, %v86_v42 }
 0x88a   :  { %106 = vst [vmem:[#allocation2 + $0x6] sm:$0x3] %v98_v35 }
 0x891   :  { %v787_v45 = vld [vmem:[#allocation2 + $0x6] sm:$0x3] }
 0x948   :  { %v856_v46 = vpop.f32.mrb[4].mxu0 }
 0x949   :  { %v860_v47 = vadd.f32 %v856_v46, %v787_v45  ;;  %v2224_v48 = vpop.f32.mrb[5].mxu0 }
 0x94b   :  { %v1991_v50 = vmul.f32 -1.442695, %v860_v47  ;;  %v751_v51 = vpop.f32.mrb[6].mxu1 }
 0x94c   :  { %v752_v52 = vadd.f32 %v2836_v60, %v751_v51  ;;  %v2213_v53 = vpop.f32.mrb[7].mxu1 }
 0x94d   :  { %2556 = vpow2.f32 %v1991_v50 }
 0x94e   :  { %v1989_v54 = vmul.f32 -1.442695, %v752_v52 }
 0x950   :  { %2558 = vpow2.f32 %v1989_v54 }
 0x951   :  { %2560 = vtanh.f32 %v860_v47 }
 0x957   :  { %v2557_v55 = vpop.eup %2556 }
 0x958   :  { %v865_v56 = vadd.f32 1.0, %v2557_v55 }
 0x95a   :  { %v2559_v57 = vpop.eup %2558  ;;  %2562 = vrcp.f32 %v865_v56 }
 0x95b   :  { %v759_v58 = vadd.f32 1.0, %v2559_v57  ;;  %2564 = vtanh.f32 %v752_v52  ;;  %v2561_v59 = vpop.eup %2560 }
 0x95d   :  { %2566 = vrcp.f32 %v759_v58 }
 0x964   :  { %v2563_v61 = vpop.eup %2562 }
 0x965   :  { %v868_v62 = vsel %vm2752_vm4, %v2561_v59, %v2563_v61  ;;  %v2565_v63 = vpop.eup %2564 }
 0x966   :  { %871 = vrot.lane.b32.xlu0 %v868_v62, %s2651_s19  ;;  %v869_v9 = vmul.f32 %v868_v62, %v2899_v21 }
 0x967   :  { %v2567_v1 = vpop.eup %2566 }
 0x968   :  { %v762_v2 = vsel %vm2752_vm4, %v2565_v63, %v2567_v1 }
 0x969   :  { %765 = vrot.lane.b32.xlu1 %v762_v2, %s2651_s19  ;;  %v763_v15 = vmul.f32 %v762_v2, %v2903_v27  ;;  %v35_v27 = vld [vmem:[%s3190_s0 + $0x8] sm:$0x3] }
 0x9d8   :  { %v872_v3 = vpop.permute.xlu0 %871 }
 0x9d9   :  { %v874_v6 = vmul.f32 %v872_v3, %v868_v62 }
 0x9db   :  { %876 = vrot.lane.b32.xlu0 %v874_v6, %s2650_s3  ;;  %v766_v7 = vpop.permute.xlu1 %765 }
 0x9dc   :  { %v768_v8 = vmul.f32 %v766_v7, %v762_v2 }
 0x9de   :  { %770 = vrot.lane.b32.xlu1 %v768_v8, %s2650_s3 }
 0xa4d   :  { %v877_v11 = vpop.permute.xlu0 %876 }
 0xa4e   :  { %v2947_v14 = vadd.f32 %v877_v11, %v869_v9 }
 0xa50   :  { %2568 = vtanh.f32 %v2947_v14  ;;  %v771_v16 = vpop.permute.xlu1 %770 }
 0xa51   :  { %v2951_v17 = vadd.f32 %v771_v16, %v763_v15 }
 0xa53   :  { %2570 = vtanh.f32 %v2951_v17 }
 0xa5a   :  { %v2569_v18 = vpop.eup %2568 }
 0xa5b   :  { %882 = vrot.lane.b32.xlu0 %v2569_v18, %s2651_s19 }
 0xa5d   :  { %v2571_v19 = vpop.eup %2570 }
 0xa5e   :  { %776 = vrot.lane.b32.xlu1 %v2571_v19, %s2651_s19 }
 0xacd   :  { %v883_v20 = vpop.permute.xlu0 %882 }
 0xace   :  { %v885_v21 = vmul.f32 %v883_v20, %v868_v62 }
 0xad0   :  { %887 = vrot.lane.b32.xlu1 %v885_v21, %s2650_s3  ;;  %v777_v22 = vpop.permute.xlu1 %776 }
 0xad1   :  { %v2957_v24 = vmul.f32 %v777_v22, %v762_v2 }
 0xad3   :  { %890 = vrot.lane.b32.xlu0 %v2957_v24, %s2651_s19 }
 0xad4   :  { %61 = vperm.xlu1 %2515, %v35_v27  }
 0xb42   :  { %v888_v28 = vpop.permute.xlu1 %887 }
 0xb43   :  { %2253 = vmatmul.mubr.msk.f32.vlgmr.msra.gmra.mrb[8].mxu1 %vm136_vm1, %v888_v28 }
 0xb44   :  { %2444 = vmatpush3.bf16.msra.mxu1 %v2772_v39  ;;  %2271 = vmatprep.mubr.msk.f32.mxu1 %vm2647_vm0, %v2648_v4 }
 0xb45   :  { %v891_v29 = vpop.permute.xlu0 %890  ;;  %2445 = vmatprep.subr.bf16.mxu1 %v2646_v0 }
 0xb46   :  { %v893_v30 = vsel %vm136_vm1, %v888_v28, %v891_v29 }
 0xb47   :  { %2242 = vmatmul.mubr.msk.f32.vlgmr.msra.gmra.mrb[6].mxu0 %vm253_vm5, %v893_v30 }
 0xb48   :  { %2456 = vmatpush3.bf16.msra.mxu0 %v2704_v5  ;;  %2447 = vmatpush3.bf16.msra.mxu1 %v2778_v41 }
 0xb49   :  { %2457 = vmatprep.subr.bf16.mxu0 %v2646_v0  ;;  %2448 = vmatprep.subr.bf16.mxu1 %v2646_v0 }
 0xb4a   :  { %2282 = vmatprep.mubr.msk.f32.mxu0 %vm2647_vm0, %v2648_v4 }
 0xb4c   :  { %2459 = vmatpush3.bf16.msra.mxu0 %v2719_v10  ;;  %2450 = vmatpush3.bf16.msra.mxu1 %v2788_v44 }
 0xb4d   :  { %2451 = vmatprep.subr.bf16.mxu1 %v2646_v0  ;;  %2460 = vmatprep.subr.bf16.mxu0 %v2646_v0 }
 0xb50   :  { %2453 = vmatpush3.bf16.msra.mxu1 %v2802_v49 }
 0xb51   :  { %2472 = vmatprep.subr.bf16.mxu1 %v2646_v0 }
 0xb53   :  { %v62_v31 = vpop.permute.xlu1 %61 }
 0xb54   :  { %v87_v32 = vmul.f32 %v2738_v12, %v62_v31 }
 0xb56   :  { %v99_v34 = vadd.f32 %v2743_v13, %v87_v32 }
 0xb58   :  { %107 = vst [vmem:[#allocation2 + $0x8] sm:$0x3] %v99_v34 }
 0xb5f   :  { %v999_v36 = vld [vmem:[#allocation2 + $0x8] sm:$0x3] }
 0xc16   :  { %v1068_v37 = vpop.f32.mrb[8].mxu1 }
 0xc17   :  { %v1072_v38 = vadd.f32 %v1068_v37, %v999_v36  ;;  %v2254_v40 = vpop.f32.mrb[9].mxu1 }
 0xc19   :  { %v1995_v42 = vmul.f32 -1.442695, %v1072_v38 }
 0xc1a   :  { %v963_v35 = vpop.f32.mrb[6].mxu0 }
 0xc1b   :  { %2572 = vpow2.f32 %v1995_v42  ;;  %v964_v45 = vadd.f32 %v2836_v60, %v963_v35  ;;  %v2243_v46 = vpop.f32.mrb[7].mxu0 }
 0xc1d   :  { %v1993_v47 = vmul.f32 -1.442695, %v964_v45 }
 0xc1f   :  { %2574 = vpow2.f32 %v1993_v47 }
 0xc20   :  { %2576 = vtanh.f32 %v1072_v38 }
 0xc25   :  { %v2573_v48 = vpop.eup %2572 }
 0xc26   :  { %v1077_v50 = vadd.f32 1.0, %v2573_v48 }
 0xc28   :  { %2578 = vrcp.f32 %v1077_v50 }
 0xc29   :  { %v2575_v51 = vpop.eup %2574  ;;  %2580 = vtanh.f32 %v964_v45 }
 0xc2a   :  { %v971_v52 = vadd.f32 1.0, %v2575_v51  ;;  %v2577_v53 = vpop.eup %2576 }
 0xc2c   :  { %2582 = vrcp.f32 %v971_v52 }
 0xc32   :  { %v2579_v54 = vpop.eup %2578 }
 0xc33   :  { %v1080_v55 = vsel %vm2752_vm4, %v2577_v53, %v2579_v54  ;;  %v2581_v56 = vpop.eup %2580 }
 0xc34   :  { %1083 = vrot.lane.b32.xlu1 %v1080_v55, %s2651_s19  ;;  %v1081_v1 = vmul.f32 %v1080_v55, %v2947_v14 }
 0xc36   :  { %v2583_v57 = vpop.eup %2582 }
 0xc37   :  { %v974_v58 = vsel %vm2752_vm4, %v2581_v56, %v2583_v57 }
 0xc38   :  { %977 = vrot.lane.b32.xlu0 %v974_v58, %s2651_s19  ;;  %v975_v6 = vmul.f32 %v974_v58, %v2951_v17  ;;  %v36_v17 = vld [vmem:[%s3190_s0 + $0xa] sm:$0x3] }
 0xca6   :  { %v1084_v59 = vpop.permute.xlu1 %1083 }
 0xca7   :  { %v1086_v61 = vmul.f32 %v1084_v59, %v1080_v55 }
 0xca9   :  { %1088 = vrot.lane.b32.xlu1 %v1086_v61, %s2650_s3 }
 0xcaa   :  { %v978_v62 = vpop.permute.xlu0 %977 }
 0xcab   :  { %v980_v63 = vmul.f32 %v978_v62, %v974_v58 }
 0xcad   :  { %982 = vrot.lane.b32.xlu0 %v980_v63, %s2650_s3 }
 0xd1b   :  { %v1089_v2 = vpop.permute.xlu1 %1088 }
 0xd1c   :  { %v2995_v3 = vadd.f32 %v1089_v2, %v1081_v1 }
 0xd1e   :  { %2584 = vtanh.f32 %v2995_v3 }
 0xd1f   :  { %v983_v7 = vpop.permute.xlu0 %982 }
 0xd20   :  { %v2999_v8 = vadd.f32 %v983_v7, %v975_v6 }
 0xd22   :  { %2586 = vtanh.f32 %v2999_v8 }
 0xd28   :  { %v2585_v9 = vpop.eup %2584 }
 0xd29   :  { %1094 = vrot.lane.b32.xlu1 %v2585_v9, %s2651_s19  ;;  %v37_v9 = vld [vmem:[%s3190_s0 + $0xc] sm:$0x3] }
 0xd2c   :  { %v2587_v11 = vpop.eup %2586 }
 0xd2d   :  { %988 = vrot.lane.b32.xlu0 %v2587_v11, %s2651_s19 }
 0xd9b   :  { %v1095_v15 = vpop.permute.xlu1 %1094 }
 0xd9c   :  { %v1097_v14 = vmul.f32 %v1095_v15, %v1080_v55 }
 0xd9e   :  { %1099 = vrot.lane.b32.xlu0 %v1097_v14, %s2650_s3 }
 0xd9f   :  { %v989_v16 = vpop.permute.xlu0 %988 }
 0xda0   :  { %v3008_v18 = vmul.f32 %v989_v16, %v974_v58 }
 0xda2   :  { %1102 = vrot.lane.b32.xlu1 %v3008_v18, %s2651_s19  ;;  %66 = vperm.xlu0 %2514, %v36_v17  }
 0xe10   :  { %v1100_v19 = vpop.permute.xlu0 %1099 }
 0xe11   :  { %2283 = vmatmul.mubr.msk.f32.vlgmr.msra.gmra.mrb[8].mxu0 %vm136_vm1, %v1100_v19 }
 0xe12   :  { %2462 = vmatpush3.bf16.msra.mxu0 %v2772_v39  ;;  %2301 = vmatprep.mubr.msk.f32.mxu0 %vm2647_vm0, %v2648_v4 }
 0xe13   :  { %2463 = vmatprep.subr.bf16.mxu0 %v2646_v0 }
 0xe14   :  { %v1103_v20 = vpop.permute.xlu1 %1102 }
 0xe15   :  { %v1105_v21 = vsel %vm136_vm1, %v1100_v19, %v1103_v20 }
 0xe16   :  { %2272 = vmatmul.mubr.msk.f32.vlgmr.msra.gmra.mrb[10].mxu1 %vm253_vm5, %v1105_v21  ;;  %2465 = vmatpush3.bf16.msra.mxu0 %v2778_v41 }
 0xe17   :  { %2474 = vmatpush3.bf16.msra.mxu1 %v2704_v5  ;;  %2466 = vmatprep.subr.bf16.mxu0 %v2646_v0 }
 0xe18   :  { %2475 = vmatprep.subr.bf16.mxu1 %v2646_v0  ;;  %2312 = vmatprep.mubr.msk.f32.mxu1 %vm2647_vm0, %v2648_v4 }
 0xe1a   :  { %2468 = vmatpush3.bf16.msra.mxu0 %v2788_v44 }
 0xe1b   :  { %2477 = vmatpush3.bf16.msra.mxu1 %v2719_v10  ;;  %2469 = vmatprep.subr.bf16.mxu0 %v2646_v0 }
 0xe1c   :  { %2478 = vmatprep.subr.bf16.mxu1 %v2646_v0 }
 0xe1e   :  { %2471 = vmatpush3.bf16.msra.mxu0 %v2802_v49 }
 0xe1f   :  { %2490 = vmatprep.subr.bf16.mxu0 %v2646_v0 }
 0xe21   :  { %v67_v22 = vpop.permute.xlu0 %66 }
 0xe22   :  { %v88_v27 = vmul.f32 %v2738_v12, %v67_v22 }
 0xe24   :  { %v100_v28 = vadd.f32 %v2743_v13, %v88_v27 }
 0xe26   :  { %108 = vst [vmem:[#allocation2 + $0xa] sm:$0x3] %v100_v28 }
 0xe2d   :  { %v1211_v29 = vld [vmem:[#allocation2 + $0xa] sm:$0x3] }
 0xee4   :  { %v1280_v30 = vpop.f32.mrb[8].mxu0 }
 0xee5   :  { %v1284_v31 = vadd.f32 %v1280_v30, %v1211_v29  ;;  %v2284_v32 = vpop.f32.mrb[9].mxu0 }
 0xee7   :  { %v1999_v34 = vmul.f32 -1.442695, %v1284_v31 }
 0xee9   :  { %2588 = vpow2.f32 %v1999_v34  ;;  %v1175_v36 = vpop.f32.mrb[10].mxu1 }
 0xeea   :  { %v1176_v37 = vadd.f32 %v2836_v60, %v1175_v36  ;;  %v2273_v38 = vpop.f32.mrb[11].mxu1 }
 0xeec   :  { %v1997_v40 = vmul.f32 -1.442695, %v1176_v37 }
 0xeee   :  { %2590 = vpow2.f32 %v1997_v40 }
 0xeef   :  { %2592 = vtanh.f32 %v1284_v31 }
 0xef3   :  { %v2589_v42 = vpop.eup %2588 }
 0xef4   :  { %v1289_v35 = vadd.f32 1.0, %v2589_v42 }
 0xef6   :  { %2594 = vrcp.f32 %v1289_v35 }
 0xef7   :  { %2596 = vtanh.f32 %v1176_v37 }
 0xef8   :  { %v2591_v45 = vpop.eup %2590 }
 0xef9   :  { %v1183_v46 = vadd.f32 1.0, %v2591_v45  ;;  %v2593_v47 = vpop.eup %2592 }
 0xefb   :  { %2598 = vrcp.f32 %v1183_v46 }
 0xf00   :  { %v2595_v48 = vpop.eup %2594 }
 0xf01   :  { %v1292_v50 = vsel %vm2752_vm4, %v2593_v47, %v2595_v48  ;;  %v2597_v51 = vpop.eup %2596 }
 0xf02   :  { %1295 = vrot.lane.b32.xlu0 %v1292_v50, %s2651_s19  ;;  %v1293_v58 = vmul.f32 %v1292_v50, %v2995_v3 }
 0xf05   :  { %v2599_v52 = vpop.eup %2598 }
 0xf06   :  { %v1186_v53 = vsel %vm2752_vm4, %v2597_v51, %v2599_v52 }
 0xf07   :  { %1189 = vrot.lane.b32.xlu1 %v1186_v53, %s2651_s19  ;;  %v1187_v62 = vmul.f32 %v1186_v53, %v2999_v8 }
 0xf74   :  { %v1296_v54 = vpop.permute.xlu0 %1295 }
 0xf75   :  { %v1298_v55 = vmul.f32 %v1296_v54, %v1292_v50 }
 0xf77   :  { %1300 = vrot.lane.b32.xlu0 %v1298_v55, %s2650_s3 }
 0xf79   :  { %v1190_v56 = vpop.permute.xlu1 %1189 }
 0xf7a   :  { %v1192_v57 = vmul.f32 %v1190_v56, %v1186_v53 }
 0xf7c   :  { %1194 = vrot.lane.b32.xlu1 %v1192_v57, %s2650_s3 }
 0xfe9   :  { %v1301_v59 = vpop.permute.xlu0 %1300 }
 0xfea   :  { %v3043_v61 = vadd.f32 %v1301_v59, %v1293_v58 }
 0xfec   :  { %2600 = vtanh.f32 %v3043_v61 }
 0xfee   :  { %v1195_v63 = vpop.permute.xlu1 %1194 }
 0xfef   :  { %v3047_v1 = vadd.f32 %v1195_v63, %v1187_v62 }
 0xff1   :  { %2602 = vtanh.f32 %v3047_v1 }
 0xff6   :  { %v2601_v2 = vpop.eup %2600 }
 0xff7   :  { %1306 = vrot.lane.b32.xlu0 %v2601_v2, %s2651_s19 }
 0xffb   :  { %v2603_v6 = vpop.eup %2602 }
 0xffc   :  { %1200 = vrot.lane.b32.xlu1 %v2603_v6, %s2651_s19 }
0x1069   :  { %v1307_v7 = vpop.permute.xlu0 %1306 }
0x106a   :  { %v1309_v3 = vmul.f32 %v1307_v7, %v1292_v50 }
0x106c   :  { %1311 = vrot.lane.b32.xlu1 %v1309_v3, %s2650_s3 }
0x106e   :  { %v1201_v8 = vpop.permute.xlu1 %1200 }
0x106f   :  { %v3056_v11 = vmul.f32 %v1201_v8, %v1186_v53 }
0x1070   :  { %71 = vperm.xlu1 %2515, %v37_v9  }
0x1071   :  { %1314 = vrot.lane.b32.xlu0 %v3056_v11, %s2651_s19 }
0x10de   :  { %v1312_v15 = vpop.permute.xlu1 %1311 }
0x10df   :  { %2313 = vmatmul.mubr.msk.f32.vlgmr.msra.gmra.mrb[12].mxu1 %vm136_vm1, %v1312_v15 }
0x10e0   :  { %2480 = vmatpush3.bf16.msra.mxu1 %v2772_v39  ;;  %2331 = vmatprep.mubr.msk.f32.mxu1 %vm2647_vm0, %v2648_v4 }
0x10e1   :  { %2481 = vmatprep.subr.bf16.mxu1 %v2646_v0 }
0x10e3   :  { %v1315_v14 = vpop.permute.xlu0 %1314 }
0x10e4   :  { %v1317_v16 = vsel %vm136_vm1, %v1312_v15, %v1315_v14  ;;  %2483 = vmatpush3.bf16.msra.mxu1 %v2778_v41 }
0x10e5   :  { %2302 = vmatmul.mubr.msk.f32.vlgmr.msra.gmra.mrb[10].mxu0 %vm253_vm5, %v1317_v16  ;;  %2484 = vmatprep.subr.bf16.mxu1 %v2646_v0 }
0x10e6   :  { %2492 = vmatpush3.bf16.msra.mxu0 %v2704_v5  ;;  %2342 = vmatprep.mubr.msk.f32.mxu0 %vm2647_vm0, %v2648_v4 }
0x10e7   :  { %2493 = vmatprep.subr.bf16.mxu0 %v2646_v0 }
0x10e8   :  { %2486 = vmatpush3.bf16.msra.mxu1 %v2788_v44 }
0x10e9   :  { %2487 = vmatprep.subr.bf16.mxu1 %v2646_v0 }
0x10ea   :  { %2495 = vmatpush3.bf16.msra.mxu0 %v2719_v10 }
0x10eb   :  { %2496 = vmatprep.subr.bf16.mxu0 %v2646_v0 }
0x10ec   :  { %2489 = vmatpush3.bf16.msra.mxu1 %v2802_v49 }
0x10ef   :  { %v72_v17 = vpop.permute.xlu1 %71 }
0x10f0   :  { %v89_v19 = vmul.f32 %v2738_v12, %v72_v17 }
0x10f2   :  { %v101_v5 = vadd.f32 %v2743_v13, %v89_v19 }
0x10f4   :  { %109 = vst [vmem:[#allocation2 + $0xc] sm:$0x3] %v101_v5 }
0x10fb   :  { %v1423_v20 = vld [vmem:[#allocation2 + $0xc] sm:$0x3] }
0x11b2   :  { %v1492_v21 = vpop.f32.mrb[12].mxu1 }
0x11b3   :  { %v1496_v22 = vadd.f32 %v1492_v21, %v1423_v20  ;;  %v2314_v27 = vpop.f32.mrb[13].mxu1 }
0x11b5   :  { %v2003_v28 = vmul.f32 -1.442695, %v1496_v22 }
0x11b7   :  { %2604 = vpow2.f32 %v2003_v28 }
0x11b8   :  { %v1387_v29 = vpop.f32.mrb[10].mxu0 }
0x11b9   :  { %v1388_v30 = vadd.f32 %v2836_v60, %v1387_v29  ;;  %v2303_v10 = vpop.f32.mrb[11].mxu0 }
0x11bb   :  { %v2001_v31 = vmul.f32 -1.442695, %v1388_v30 }
0x11bd   :  { %2606 = vpow2.f32 %v2001_v31 }
0x11be   :  { %2608 = vtanh.f32 %v1496_v22 }
0x11c1   :  { %v2605_v32 = vpop.eup %2604 }
0x11c2   :  { %v1501_v34 = vadd.f32 1.0, %v2605_v32 }
0x11c4   :  { %2610 = vrcp.f32 %v1501_v34 }
0x11c5   :  { %2612 = vtanh.f32 %v1388_v30 }
0x11c7   :  { %v2607_v12 = vpop.eup %2606 }
0x11c8   :  { %v1395_v36 = vadd.f32 1.0, %v2607_v12  ;;  %v2609_v13 = vpop.eup %2608 }
0x11ca   :  { %2614 = vrcp.f32 %v1395_v36 }
0x11ce   :  { %v2611_v37 = vpop.eup %2610 }
0x11cf   :  { %v1504_v38 = vsel %vm2752_vm4, %v2609_v13, %v2611_v37  ;;  %v2613_v40 = vpop.eup %2612 }
0x11d0   :  { %1507 = vrot.lane.b32.xlu1 %v1504_v38, %s2651_s19  ;;  %v1505_v50 = vmul.f32 %v1504_v38, %v3043_v61  ;;  %v38_v61 = vld [vmem:[%s3190_s0 + $0xe] sm:$0x3] }
0x11d4   :  { %v2615_v42 = vpop.eup %2614 }
0x11d5   :  { %v1398_v35 = vsel %vm2752_vm4, %v2613_v40, %v2615_v42 }
0x11d6   :  { %1401 = vrot.lane.b32.xlu0 %v1398_v35, %s2651_s19  ;;  %v1399_v53 = vmul.f32 %v1398_v35, %v3047_v1 }
0x1242   :  { %v1508_v45 = vpop.permute.xlu1 %1507 }
0x1243   :  { %v1510_v46 = vmul.f32 %v1508_v45, %v1504_v38 }
0x1245   :  { %1512 = vrot.lane.b32.xlu1 %v1510_v46, %s2650_s3 }
0x1248   :  { %v1402_v47 = vpop.permute.xlu0 %1401 }
0x1249   :  { %v1404_v48 = vmul.f32 %v1402_v47, %v1398_v35 }
0x124b   :  { %1406 = vrot.lane.b32.xlu0 %v1404_v48, %s2650_s3 }
0x12b7   :  { %v1513_v51 = vpop.permute.xlu1 %1512 }
0x12b8   :  { %v3090_v52 = vadd.f32 %v1513_v51, %v1505_v50 }
0x12ba   :  { %2616 = vtanh.f32 %v3090_v52 }
0x12bd   :  { %v1407_v54 = vpop.permute.xlu0 %1406 }
0x12be   :  { %v3094_v55 = vadd.f32 %v1407_v54, %v1399_v53 }
0x12c0   :  { %2618 = vtanh.f32 %v3094_v55 }
0x12c4   :  { %v2617_v56 = vpop.eup %2616 }
0x12c5   :  { %1518 = vrot.lane.b32.xlu1 %v2617_v56, %s2651_s19 }
0x12ca   :  { %v2619_v57 = vpop.eup %2618 }
0x12cb   :  { %1412 = vrot.lane.b32.xlu0 %v2619_v57, %s2651_s19 }
0x1337   :  { %v1519_v58 = vpop.permute.xlu1 %1518 }
0x1338   :  { %v1521_v59 = vmul.f32 %v1519_v58, %v1504_v38 }
0x133a   :  { %1523 = vrot.lane.b32.xlu0 %v1521_v59, %s2650_s3 }
0x133d   :  { %v1413_v62 = vpop.permute.xlu0 %1412 }
0x133e   :  { %v3103_v63 = vmul.f32 %v1413_v62, %v1398_v35  ;;  %76 = vperm.xlu0 %2514, %v38_v61  }
0x1340   :  { %1526 = vrot.lane.b32.xlu1 %v3103_v63, %s2651_s19 }
0x13ac   :  { %v1524_v1 = vpop.permute.xlu0 %1523 }
0x13ad   :  { %2343 = vmatmul.mubr.msk.f32.vlgmr.msra.gmra.mrb[12].mxu0 %vm136_vm1, %v1524_v1 }
0x13ae   :  { %2498 = vmatpush3.bf16.msra.mxu0 %v2772_v39  ;;  %2361 = vmatprep.mubr.msk.f32.mxu0 %vm2647_vm0, %v2648_v4  ;;  %v2644_v4 = vld [vmem:[%s3192_s2] ss:$0 sm:$0xff] }
0x13af   :  { %2499 = vmatprep.subr.bf16.mxu0 %v2646_v0 }
0x13b2   :  { %v1527_v2 = vpop.permute.xlu1 %1526  ;;  %2501 = vmatpush3.bf16.msra.mxu0 %v2778_v41  ;;  %v2645_v41 = vld [vmem:[%s3192_s2 + $0x1] ss:$0 sm:$0xff] }
0x13b3   :  { %v1529_v6 = vsel %vm136_vm1, %v1524_v1, %v1527_v2  ;;  %2502 = vmatprep.subr.bf16.mxu0 %v2646_v0 }
0x13b4   :  { %2332 = vmatmul.mubr.msk.f32.vlgmr.msra.gmra.mrb[14].mxu1 %vm253_vm5, %v1529_v6 }
0x13b6   :  { %2504 = vmatpush3.bf16.msra.mxu0 %v2788_v44 }
0x13b7   :  { %2505 = vmatprep.subr.bf16.mxu0 %v2646_v0 }
0x13ba   :  { %2507 = vmatpush3.bf16.msra.mxu0 %v2802_v49 }
0x13bd   :  { %v77_v39 = vpop.permute.xlu0 %76 }
0x13be   :  { %v90_v7 = vmul.f32 %v2644_v4, %v77_v39 }
0x13c0   :  { %v102_v3 = vadd.f32 %v2645_v41, %v90_v7 }
0x13c2   :  { %110 = vst [vmem:[#allocation2 + $0xe] sm:$0x3] %v102_v3 }
0x13c9   :  { %v1635_v9 = vld [vmem:[#allocation2 + $0xe] sm:$0x3] }
0x1480   :  { %v1704_v8 = vpop.f32.mrb[12].mxu0 }
0x1481   :  { %v1708_v15 = vadd.f32 %v1704_v8, %v1635_v9  ;;  %v2344_v44 = vpop.f32.mrb[13].mxu0 }
0x1483   :  { %v2007_v14 = vmul.f32 -1.442695, %v1708_v15 }
0x1485   :  { %2620 = vpow2.f32 %v2007_v14 }
0x1487   :  { %v1599_v0 = vpop.f32.mrb[14].mxu1 }
0x1488   :  { %v1600_v49 = vadd.f32 %v2836_v60, %v1599_v0  ;;  %v2333_v16 = vpop.f32.mrb[15].mxu1  ;;  %v12_v0 = vstv %s3195_s6 }
0x1489   :  { %13 = vst [vmem:[#allocation4] sm:$0x1] %v12_v0 }
0x148a   :  { %v2005_v17 = vmul.f32 -1.442695, %v1600_v49 }
0x148c   :  { %2622 = vpow2.f32 %v2005_v17 }
0x148d   :  { %2624 = vtanh.f32 %v1708_v15 }
0x148f   :  { %v2621_v19 = vpop.eup %2620 }
0x1490   :  { %v1713_v5 = vadd.f32 1.0, %v2621_v19 }
0x1492   :  { %2626 = vrcp.f32 %v1713_v5 }
0x1493   :  { %2628 = vtanh.f32 %v1600_v49 }
0x1496   :  { %v2623_v20 = vpop.eup %2622 }
0x1497   :  { %v1607_v21 = vadd.f32 1.0, %v2623_v20  ;;  %v2625_v22 = vpop.eup %2624 }
0x1499   :  { %2630 = vrcp.f32 %v1607_v21 }
0x149c   :  { %v2627_v27 = vpop.eup %2626 }
0x149d   :  { %v1716_v28 = vsel %vm2752_vm4, %v2625_v22, %v2627_v27  ;;  %v2629_v29 = vpop.eup %2628 }
0x149e   :  { %1719 = vrot.lane.b32.xlu0 %v1716_v28, %s2651_s19  ;;  %v1717_v36 = vmul.f32 %v1716_v28, %v3090_v52 }
0x14a3   :  { %v2631_v30 = vpop.eup %2630 }
0x14a4   :  { %v1610_v10 = vsel %vm2752_vm4, %v2629_v29, %v2631_v30 }
0x14a5   :  { %1613 = vrot.lane.b32.xlu1 %v1610_v10, %s2651_s19  ;;  %v1611_v38 = vmul.f32 %v1610_v10, %v3094_v55 }
0x1510   :  { %v1720_v31 = vpop.permute.xlu0 %1719 }
0x1511   :  { %v1722_v32 = vmul.f32 %v1720_v31, %v1716_v28 }
0x1513   :  { %1724 = vrot.lane.b32.xlu0 %v1722_v32, %s2650_s3 }
0x1517   :  { %v1614_v34 = vpop.permute.xlu1 %1613 }
0x1518   :  { %v1616_v12 = vmul.f32 %v1614_v34, %v1610_v10 }
0x151a   :  { %1618 = vrot.lane.b32.xlu1 %v1616_v12, %s2650_s3 }
0x1585   :  { %v1725_v13 = vpop.permute.xlu0 %1724 }
0x1586   :  { %v1727_v37 = vadd.f32 %v1725_v13, %v1717_v36  ;;  %v2011_v36 = vld [vmem:[#allocation4] ss:$0 sm:$0xff] }
0x1588   :  { %2632 = vtanh.f32 %v1727_v37 }
0x158c   :  { %v1619_v40 = vpop.permute.xlu1 %1618 }
0x158d   :  { %v1621_v42 = vadd.f32 %v1619_v40, %v1611_v38 }
0x158f   :  { %2634 = vtanh.f32 %v1621_v42 }
0x1592   :  { %v2633_v35 = vpop.eup %2632 }
0x1593   :  { %1730 = vrot.lane.b32.xlu0 %v2633_v35, %s2651_s19 }
0x1599   :  { %v2635_v45 = vpop.eup %2634 }
0x159a   :  { %1624 = vrot.lane.b32.xlu1 %v2635_v45, %s2651_s19 }
0x1605   :  { %v1731_v46 = vpop.permute.xlu0 %1730 }
0x1606   :  { %v1733_v47 = vmul.f32 %v1731_v46, %v1716_v28 }
0x1608   :  { %1735 = vrot.lane.b32.xlu1 %v1733_v47, %s2650_s3  ;;  %v1920_v47 = vshrl.u32 %v123_v23, 7 }
0x160c   :  { %v1625_v48 = vpop.permute.xlu1 %1624 }
0x160d   :  { %v1627_v50 = vmul.f32 %v1625_v48, %v1610_v10 }
0x160f   :  { %1738 = vrot.lane.b32.xlu0 %v1627_v50, %s2651_s19 }
0x167a   :  { %v1736_v51 = vpop.permute.xlu1 %1735 }
0x1681   :  { %v1739_v52 = vpop.permute.xlu0 %1738 }
0x1682   :  { %v1741_v53 = vsel %vm136_vm1, %v1736_v51, %v1739_v52 }
0x1683   :  { %2362 = vmatmul.mubr.msk.f32.vlgmr.msra.gmra.mrb[14].mxu0 %vm253_vm5, %v1741_v53 }
0x1756   :  { %v1811_v54 = vpop.f32.mrb[14].mxu0 }
0x1757   :  { %v1812_v55 = vadd.f32 %v2836_v60, %v1811_v54  ;;  %v2363_v56 = vpop.f32.mrb[15].mxu0 }
0x1759   :  { %v2009_v57 = vmul.f32 -1.442695, %v1812_v55 }
0x175b   :  { %2636 = vpow2.f32 %v2009_v57 }
0x175c   :  { %2638 = vtanh.f32 %v1812_v55 }
0x1765   :  { %v2637_v58 = vpop.eup %2636 }
0x1766   :  { %v1819_v59 = vadd.f32 1.0, %v2637_v58  ;;  %v2639_v61 = vpop.eup %2638 }
0x1768   :  { %2640 = vrcp.f32 %v1819_v59 }
0x1772   :  { %v2641_v62 = vpop.eup %2640 }
0x1773   :  { %v1822_v1 = vsel %vm2752_vm4, %v2639_v61, %v2641_v62 }
0x1774   :  { %1825 = vrot.lane.b32.xlu1 %v1822_v1, %s2651_s19  ;;  %v1823_v60 = vmul.f32 %v1822_v1, %v1621_v42 }
0x17e6   :  { %v1826_v2 = vpop.permute.xlu1 %1825 }
0x17e7   :  { %v1828_v6 = vmul.f32 %v1826_v2, %v1822_v1 }
0x17e9   :  { %1830 = vrot.lane.b32.xlu0 %v1828_v6, %s2650_s3 }
0x17ed   :  { %357 = vrot.lane.b32.xlu0 %v2860_v43, %s2650_s3  ;;  %v2010_v43 = vld [vmem:[%s3194_s5] ss:$0 sm:$0xff] }
0x17f1   :  { %781 = vrot.lane.b32.xlu0 %v2957_v24, %s2650_s3 }
0x17f5   :  { %1205 = vrot.lane.b32.xlu0 %v3056_v11, %s2650_s3 }
0x17f9   :  { %1629 = vrot.lane.b32.xlu0 %v1627_v50, %s2650_s3  ;;  %v1921_v50 = vsub.s32 %v2748_v25, %v1920_v47 }
0x185b   :  { %v1831_v26 = vpop.permute.xlu0 %1830 }
0x185c   :  { %v1833_v39 = vadd.f32 %v1831_v26, %v1823_v60 }
0x185e   :  { %2642 = vtanh.f32 %v1833_v39 }
0x185f   :  { %v358_v4 = vpop.permute.xlu0 %357 }
0x1860   :  { %361 = vst.msk [vmem:[#allocation3] sm:$0x3] %vm360_vm6, %v358_v4 }
0x1863   :  { %v782_v7 = vpop.permute.xlu0 %781 }
0x1864   :  { %785 = vst.msk [vmem:[#allocation3 + $0x4] sm:$0x3] %vm360_vm6, %v782_v7 }
0x1867   :  { %v1206_v24 = vpop.permute.xlu0 %1205  ;;  %v1846_v41 = vld [vmem:[#allocation3] sm:$0x3] }
0x1868   :  { %v2643_v11 = vpop.eup %2642  ;;  %1209 = vst.msk [vmem:[#allocation3 + $0x8] sm:$0x3] %vm360_vm6, %v1206_v24  ;;  %v1861_v3 = vmul.f32 %v2010_v43, %v1846_v41 }
0x1869   :  { %1836 = vrot.lane.b32.xlu1 %v2643_v11, %s2651_s19 }
0x186a   :  { %v1869_v9 = vsel %vm360_vm6, %v1861_v3, 0.0 }
0x186b   :  { %1870 = vadd.xlane.f32.xlu0 %v1869_v9  ;;  %v1630_v8 = vpop.permute.xlu0 %1629  ;;  %v1848_v15 = vld [vmem:[#allocation3 + $0x4] sm:$0x3] }
0x186c   :  { %1633 = vst.msk [vmem:[#allocation3 + $0xc] sm:$0x3] %vm360_vm6, %v1630_v8  ;;  %v1863_v44 = vmul.f32 %v2010_v43, %v1848_v15 }
0x186d   :  { %569 = vrot.lane.b32.xlu1 %v2908_v33, %s2650_s3 }
0x186e   :  { %v1875_v14 = vsel %vm360_vm6, %v1863_v44, 0.0 }
0x186f   :  { %1876 = vadd.xlane.f32.xlu0 %v1875_v14  ;;  %v1850_v29 = vld [vmem:[#allocation3 + $0x8] sm:$0x3] }
0x1870   :  { %v1865_v10 = vmul.f32 %v2010_v43, %v1850_v29 }
0x1871   :  { %993 = vrot.lane.b32.xlu1 %v3008_v18, %s2650_s3 }
0x1872   :  { %v1881_v32 = vsel %vm360_vm6, %v1865_v10, 0.0 }
0x1873   :  { %v1852_v31 = vld [vmem:[#allocation3 + $0xc] sm:$0x3] }
0x1874   :  { %v1867_v34 = vmul.f32 %v2010_v43, %v1852_v31 }
0x1875   :  { %1417 = vrot.lane.b32.xlu1 %v3103_v63, %s2650_s3 }
0x1876   :  { %v1887_v12 = vsel %vm360_vm6, %v1867_v34, 0.0 }
0x18db   :  { %v1837_v49 = vpop.permute.xlu1 %1836 }
0x18dc   :  { %v1839_v16 = vmul.f32 %v1837_v49, %v1822_v1 }
0x18de   :  { %1841 = vrot.lane.b32.xlu1 %v1839_v16, %s2650_s3 }
0x18df   :  { %v570_v17 = vpop.permute.xlu1 %569 }
0x18e0   :  { %573 = vst.msk [vmem:[#allocation3 + $0x2] sm:$0x3] %vm360_vm6, %v570_v17 }
0x18e3   :  { %v994_v33 = vpop.permute.xlu1 %993 }
0x18e4   :  { %997 = vst.msk [vmem:[#allocation3 + $0x6] sm:$0x3] %vm360_vm6, %v994_v33 }
0x18e7   :  { %v1418_v19 = vpop.permute.xlu1 %1417  ;;  %v1847_v27 = vld [vmem:[#allocation3 + $0x2] sm:$0x3] }
0x18e8   :  { %1421 = vst.msk [vmem:[#allocation3 + $0xa] sm:$0x3] %vm360_vm6, %v1418_v19  ;;  %v1862_v28 = vmul.f32 %v2010_v43, %v1847_v27 }
0x18ea   :  { %v1872_v30 = vsel %vm360_vm6, %v1862_v28, 0.0 }
0x18eb   :  { %v1849_v18 = vld [vmem:[#allocation3 + $0x6] sm:$0x3] }
0x18ec   :  { %v1864_v63 = vmul.f32 %v2010_v43, %v1849_v18 }
0x18ee   :  { %v1878_v5 = vsel %vm360_vm6, %v1864_v63, 0.0 }
0x18ef   :  { %1879 = vadd.xlane.f32.xlu0 %v1878_v5  ;;  %v1851_v20 = vld [vmem:[#allocation3 + $0xa] sm:$0x3] }
0x18f0   :  { %v1866_v21 = vmul.f32 %v2010_v43, %v1851_v20 }
0x18f2   :  { %v1884_v22 = vsel %vm360_vm6, %v1866_v21, 0.0 }
0x18f3   :  { %1885 = vadd.xlane.f32.xlu0 %v1884_v22 }
0x18f8   :  { %v1871_v46 = vpop.xlane.xlu0 %1870 }
0x18fc   :  { %v1877_v53 = vpop.xlane.xlu0 %1876 }
0x1902   :  { %1873 = vadd.xlane.f32.xlu1 %v1872_v30 }
0x1906   :  { %1882 = vadd.xlane.f32.xlu1 %v1881_v32 }
0x190a   :  { %1888 = vadd.xlane.f32.xlu1 %v1887_v12 }
0x191b   :  { %1900 = vperm.xlu1 %2515, %v2011_v36  }
0x1950   :  { %v1842_v13 = vpop.permute.xlu1 %1841 }
0x1951   :  { %1845 = vst.msk [vmem:[#allocation3 + $0xe] sm:$0x3] %vm360_vm6, %v1842_v13 }
0x1958   :  { %v1853_v37 = vld [vmem:[#allocation3 + $0xe] sm:$0x3] }
0x1959   :  { %v1868_v38 = vmul.f32 %v2010_v43, %v1853_v37 }
0x195b   :  { %v1890_v40 = vsel %vm360_vm6, %v1868_v38, 0.0 }
0x195c   :  { %1891 = vadd.xlane.f32.xlu0 %v1890_v40 }
0x197c   :  { %v1880_v57 = vpop.xlane.xlu0 %1879 }
0x1980   :  { %v1886_v23 = vpop.xlane.xlu0 %1885 }
0x198f   :  { %v1874_v42 = vpop.xlane.xlu1 %1873 }
0x1993   :  { %v1883_v35 = vpop.xlane.xlu1 %1882 }
0x1997   :  { %v1889_v45 = vpop.xlane.xlu1 %1888 }
0x199b   :  { %v1901_v48 = vpop.permute.xlu1 %1900 }
0x199c   :  { %v1903_v51 = vadd.f32 %v1901_v48, %v1871_v46  ;;  %v1904_v52 = vadd.f32 %v1901_v48, %v1874_v42  ;;  %v1905_v54 = vadd.f32 %v1901_v48, %v1877_v53  ;;  %v1906_v59 = vadd.f32 %v1901_v48, %v1880_v57 }
0x199d   :  { %v1907_v62 = vadd.f32 %v1901_v48, %v1883_v35  ;;  %v1908_v6 = vadd.f32 %v1901_v48, %v1886_v23  ;;  %v1909_v26 = vadd.f32 %v1901_v48, %v1889_v45 }
0x199e   :  { %v1922_v55 = vrot.slane %v1903_v51, %v1921_v50  ;;  %v1926_v56 = vrot.slane %v1904_v52, %v1921_v50  ;;  %v1930_v58 = vrot.slane %v1905_v54, %v1921_v50  ;;  %v1934_v2 = vrot.slane %v1906_v59, %v1921_v50 }
0x199f   :  { %v1938_v60 = vrot.slane %v1907_v62, %v1921_v50  ;;  %v1942_v4 = vrot.slane %v1908_v6, %v1921_v50  ;;  %v1946_v41 = vrot.slane %v1909_v26, %v1921_v50 }
0x19a0   :  { %v1952_v61 = vsel %vm1951_vm7, %v1926_v56, %v1922_v55 }
0x19a1   :  { %v1954_v1 = vsel %vm1953_vm8, %v1930_v58, %v1952_v61 }
0x19a2   :  { %v1956_v25 = vsel %vm1955_vm9, %v1934_v2, %v1954_v1 }
0x19a3   :  { %v1958_v39 = vsel %vm1957_vm10, %v1938_v60, %v1956_v25 }
0x19a4   :  { %v1960_v24 = vsel %vm1959_vm11, %v1942_v4, %v1958_v39 }
0x19a5   :  { %v1962_v3 = vsel %vm1961_vm12, %v1946_v41, %v1960_v24 }
0x19e9   :  { %v1892_v7 = vpop.xlane.xlu0 %1891 }
0x19ea   :  { %v1910_v43 = vadd.f32 %v1901_v48, %v1892_v7 }
0x19ec   :  { %v1950_v11 = vrot.slane %v1910_v43, %v1921_v50 }
0x19ee   :  { %v1964_v9 = vsel %vm1963_vm13, %v1950_v11, %v1962_v3 }
0x19ef   :  { %1967 = vst.msk [vmem:[%s3196_s7] sm:$0xff] %vm1966_vm14, %v1964_v9 }

</bundles_post_ra>
